<compile_context>
chip_gen: v5e
topology: v5e:2x2
jax: 0.10.0
libtpu: 0.0.40
codegen_flags: <defaults>
</compile_context>

<pallas_src>
import functools
import math

import jax
import jax.numpy as jnp
import numpy as np
from jax import lax
from jax.experimental import pallas as pl
from jax.experimental.pallas import tpu as pltpu


# ----------------------------------------------------------------------------
# One-time host-side parameter preparation (PyTorch layouts in).
# ----------------------------------------------------------------------------
def _toeplitz_w(K_oihw, W):
    """Fold a 3x3 (stride 1, pad 1) conv kernel into a Toeplitz-in-W matmul weight.

    Rows:  kh*(W*Cin) + wi*Cin + ci   (matches concat over kh of row-shifted
                                       (H, W*Cin) channel-minor input)
    Cols:  ow*Cout + co               (channel-minor (H, W*Cout) output)
    The zero padding along W is implicit (taps outside [0, W) are dropped).
    """
    Cout, Cin, KH, KW = K_oihw.shape
    T = np.zeros((KH * W * Cin, W * Cout), np.float32)
    for kh in range(KH):
        for wi in range(W):
            for kw in range(KW):
                ow = wi - kw + 1                     # output column this tap feeds
                if 0 <= ow < W:
                    r0 = kh * W * Cin + wi * Cin
                    T[r0:r0 + Cin, ow * Cout:(ow + 1) * Cout] = K_oihw[:, :, kh, kw].T
    return T


def prepare_params(params, input_hw):
    """Rewrite PyTorch-layout parameters once; nothing here runs per forward."""
    wc1, bc1, wc2, bc2, wf1, bf1, wf2, bf2 = params
    H = W = input_hw
    H2, W2 = (H + 1) // 2, (W + 1) // 2
    H4, W4 = (H2 + 1) // 2, (W2 + 1) // 2
    C1 = wc1.shape[0]                      # 16
    C2 = wc2.shape[0]                      # 32
    nh = wf1.shape[0]                      # 128

    t1 = _toeplitz_w(np.asarray(wc1, np.float32), W)    # (3*W,      W*C1)
    t2 = _toeplitz_w(np.asarray(wc2, np.float32), W2)   # (3*W2*C1,  W2*C2)
    b1r = np.tile(np.asarray(bc1, np.float32), W)[None, :]    # (1, W*C1)
    b2r = np.tile(np.asarray(bc2, np.float32), W2)[None, :]   # (1, W2*C2)

    # fc1 weight permuted so it consumes features in our (h, w, c)-major order
    # (torch flattens NCHW, i.e. (c, h, w)-major).
    w1p = np.asarray(wf1, np.float32).reshape(nh, C2, H4, W4)      # (j, c, h, w)
    w1p = np.transpose(w1p, (2, 3, 1, 0)).reshape(H4 * W4 * C2, nh)
    bf1r = np.asarray(bf1, np.float32)[None, :]                    # (1, nh)
    w2r = np.asarray(wf2, np.float32).reshape(1, nh)               # (1, nh)
    bf2r = np.asarray(bf2, np.float32).reshape(1, 1)

    return dict(
        t1=jnp.asarray(t1, jnp.bfloat16), b1r=jnp.asarray(b1r),
        t2=jnp.asarray(t2, jnp.bfloat16), b2r=jnp.asarray(b2r),
        w1p=jnp.asarray(w1p, jnp.bfloat16), bf1r=jnp.asarray(bf1r),
        w2r=jnp.asarray(w2r), bf2r=jnp.asarray(bf2r),
        dims=(H, W, C1, C2),
    )


# ----------------------------------------------------------------------------
# In-kernel helpers.
# ----------------------------------------------------------------------------
def _maxpool_3x3s2p1(y, H, W, C):
    """MaxPool2d(kernel=3, stride=2, padding=1) on a (H, W*C) channel-minor tile.

    Only static contiguous slices + elementwise max (robust lowering).  Taps
    that fall into the padding region are simply dropped -- exactly equivalent
    to -inf padding, so this matches PyTorch bit-for-bit in f32.
    """
    Ho, Wo = (H + 1) // 2, (W + 1) // 2
    rows = []
    for oh in range(Ho):                                    # H direction
        hs = [h for h in (2 * oh - 1, 2 * oh, 2 * oh + 1) if 0 <= h < H]
        m = y[hs[0]:hs[0] + 1, :]
        for h in hs[1:]:
            m = jnp.maximum(m, y[h:h + 1, :])
        rows.append(m)
    r = jnp.concatenate(rows, axis=0)                       # (Ho, W*C)
    cols = []
    for ow in range(Wo):                                    # W direction (C-lane chunks)
        ws = [w for w in (2 * ow - 1, 2 * ow, 2 * ow + 1) if 0 <= w < W]
        m = r[:, ws[0] * C:(ws[0] + 1) * C]
        for w in ws[1:]:
            m = jnp.maximum(m, r[:, w * C:(w + 1) * C])
        cols.append(m)
    return jnp.concatenate(cols, axis=1)                    # (Ho, Wo*C)


# ----------------------------------------------------------------------------
# Fused kernel: conv1+ReLU+pool1+conv2+ReLU+pool2+fc1+ReLU+fc2 for one batch
# element.  All intermediates stay in VMEM/vregs.
# ----------------------------------------------------------------------------
def _music_classifier_kernel(x_ref, t1_ref, b1_ref, t2_ref, b2_ref,
                             w1p_ref, bf1_ref, w2_ref, bf2_ref, o_ref,
                             *, H, W, C1, C2):
    f32, bf16 = jnp.float32, jnp.bfloat16

    # ---- conv1 (3x3, pad 1) + bias + ReLU: one (H, 3W) @ (3W, W*C1) matmul ----
    x = x_ref[...]                                              # (H, W) f32
    zr = jnp.zeros((1, W), f32)
    xrp = jnp.concatenate([zr, x, zr], axis=0)                  # row-padded (H+2, W)
    xcat = jnp.concatenate([xrp[0:H], xrp[1:H + 1], xrp[2:H + 2]], axis=1)   # (H, 3W)
    y1 = jnp.dot(xcat.astype(bf16), t1_ref[...], preferred_element_type=f32)
    y1 = jnp.maximum(y1 + b1_ref[...], 0.0)                     # (H, W*C1) lane-dense

    # ---- maxpool1 ----
    p1 = _maxpool_3x3s2p1(y1, H, W, C1)                         # (H2, W2*C1)
    H2, W2 = (H + 1) // 2, (W + 1) // 2

    # ---- conv2 + bias + ReLU: one (H2, 3*W2*C1) @ (3*W2*C1, W2*C2) matmul ----
    zr2 = jnp.zeros((1, W2 * C1), f32)
    p1rp = jnp.concatenate([zr2, p1, zr2], axis=0)              # (H2+2, W2*C1)
    x2cat = jnp.concatenate([p1rp[0:H2], p1rp[1:H2 + 1], p1rp[2:H2 + 2]], axis=1)
    y2 = jnp.dot(x2cat.astype(bf16), t2_ref[...], preferred_element_type=f32)
    y2 = jnp.maximum(y2 + b2_ref[...], 0.0)                     # (H2, W2*C2)

    # ---- maxpool2 ----
    p2 = _maxpool_3x3s2p1(y2, H2, W2, C2)                       # (H4, W4*C2)
    H4 = (H2 + 1) // 2

    # ---- flatten (h, w, c)-major; fc1 weight was pre-permuted to this order ----
    feat = jnp.concatenate([p2[h:h + 1, :] for h in range(H4)], axis=1)   # (1, H4*W4*C2)

    # ---- fc1 + ReLU (MXU), fc2 as VPU multiply + lane reduce (out dim == 1) ----
    h1 = jnp.dot(feat.astype(bf16), w1p_ref[...], preferred_element_type=f32)
    h1 = jnp.maximum(h1 + bf1_ref[...], 0.0)                    # (1, 128)
    o_ref[...] = jnp.sum(h1 * w2_ref[...], axis=1, keepdims=True) + bf2_ref[...]


# ----------------------------------------------------------------------------
# Forward wrapper: a single pallas_call over the batch.
# ----------------------------------------------------------------------------
def music_classifier_forward(x_nchw, prepped):
    t1, b1r = prepped["t1"], prepped["b1r"]
    t2, b2r = prepped["t2"], prepped["b2r"]
    w1p, bf1r = prepped["w1p"], prepped["bf1r"]
    w2r, bf2r = prepped["w2r"], prepped["bf2r"]
    H, W, C1, C2 = prepped["dims"]
    N = x_nchw.shape[0]
    x = x_nchw.reshape(N, H, W)          # Cin == 1 -> metadata-only reshape

    H2, W2 = (H + 1) // 2, (W + 1) // 2
    H4, W4 = (H2 + 1) // 2, (W2 + 1) // 2
    nh = w1p.shape[1]

    flops = 2 * N * (H * (3 * W) * (W * C1)
                     + H2 * (3 * W2 * C1) * (W2 * C2)
                     + (H4 * W4 * C2) * nh + nh)
    bytes_accessed = (x.size * 4 + t1.size * 2 + t2.size * 2 + w1p.size * 2
                      + (b1r.size + b2r.size + bf1r.size + w2r.size + bf2r.size) * 4
                      + N * 4)

    def wspec(a):
        return pl.BlockSpec(a.shape, lambda n: (0, 0))   # whole array, DMA'd once

    out = pl.pallas_call(
        functools.partial(_music_classifier_kernel, H=H, W=W, C1=C1, C2=C2),
        out_shape=jax.ShapeDtypeStruct((N, 1, 1), jnp.float32),
        grid=(N,),
        in_specs=[
            pl.BlockSpec((None, H, W), lambda n: (n, 0, 0)),
            wspec(t1), wspec(b1r), wspec(t2), wspec(b2r),
            wspec(w1p), wspec(bf1r), wspec(w2r), wspec(bf2r),
        ],
        out_specs=pl.BlockSpec((None, 1, 1), lambda n: (n, 0, 0)),
        compiler_params=pltpu.CompilerParams(dimension_semantics=("parallel",)),
        cost_estimate=pl.CostEstimate(flops=flops, transcendentals=0,
                                      bytes_accessed=bytes_accessed),
    )(x, t1, b1r, t2, b2r, w1p, bf1r, w2r, bf2r)
    return out.reshape(N, 1)


# ----------------------------------------------------------------------------
# Pure-JAX f32 reference (correctness check only).
# ----------------------------------------------------------------------------
def reference_forward(x_nchw, params):
    wc1, bc1, wc2, bc2, wf1, bf1, wf2, bf2 = params
    dn = ("NCHW", "OIHW", "NCHW")
    y = lax.conv_general_dilated(x_nchw, wc1, (1, 1), ((1, 1), (1, 1)),
                                 dimension_numbers=dn)
    y = jnp.maximum(y + bc1[None, :, None, None], 0.0)
    y = lax.reduce_window(y, -jnp.inf, lax.max, (1, 1, 3, 3), (1, 1, 2, 2),
                          ((0, 0), (0, 0), (1, 1), (1, 1)))
    y = lax.conv_general_dilated(y, wc2, (1, 1), ((1, 1), (1, 1)),
                                 dimension_numbers=dn)
    y = jnp.maximum(y + bc2[None, :, None, None], 0.0)
    y = lax.reduce_window(y, -jnp.inf, lax.max, (1, 1, 3, 3), (1, 1, 2, 2),
                          ((0, 0), (0, 0), (1, 1), (1, 1)))
    y = y.reshape(y.shape[0], -1)
    y = jnp.maximum(y @ wf1.T + bf1, 0.0)
    return y @ wf2.T + bf2


if __name__ == "__main__":
    input_dimensions = 16
    N = 2
    feat = 32 * math.ceil(input_dimensions / 4) * math.ceil(input_dimensions / 4)

    key = jax.random.PRNGKey(0)
    ks = jax.random.split(key, 9)
    x = jax.random.normal(ks[0], (N, 1, input_dimensions, input_dimensions), jnp.float32)

    # Deterministic synthetic parameters (PyTorch layouts: OIHW / (out, in)).
    wc1 = jax.random.normal(ks[1], (16, 1, 3, 3), jnp.float32) * 0.30
    bc1 = jax.random.normal(ks[2], (16,), jnp.float32) * 0.10
    wc2 = jax.random.normal(ks[3], (32, 16, 3, 3), jnp.float32) * 0.08
    bc2 = jax.random.normal(ks[4], (32,), jnp.float32) * 0.10
    wf1 = jax.random.normal(ks[5], (128, feat), jnp.float32) * 0.04
    bf1 = jax.random.normal(ks[6], (128,), jnp.float32) * 0.10
    wf2 = jax.random.normal(ks[7], (1, 128), jnp.float32) * 0.10
    bf2 = jax.random.normal(ks[8], (1,), jnp.float32) * 0.10
    params = (wc1, bc1, wc2, bc2, wf1, bf1, wf2, bf2)

    prepped = prepare_params(params, input_dimensions)   # one-time weight rewrite
    fwd = jax.jit(lambda inp: music_classifier_forward(inp, prepped))

    out = jax.block_until_ready(fwd(x))
    assert out.shape == (N, 1)

    ref = reference_forward(x, params)
    # bf16 matmul operands with f32 accumulation -> ~0.5% error; 3e-2 is ample.
    np.testing.assert_allclose(np.asarray(out), np.asarray(ref), rtol=3e-2, atol=3e-2)

    print("KERNEL_OK")
</pallas_src>

<mosaic_0001>
module attributes {stable_mosaic.version = 11 : i64} {
  func.func @_music_classifier_kernel(%arg0: i32, %arg1: memref<1x16x16xf32, #tpu.memory_space<vmem>>, %arg2: memref<48x256xbf16, #tpu.memory_space<vmem>>, %arg3: memref<1x256xf32, #tpu.memory_space<vmem>>, %arg4: memref<384x256xbf16, #tpu.memory_space<vmem>>, %arg5: memref<1x256xf32, #tpu.memory_space<vmem>>, %arg6: memref<512x128xbf16, #tpu.memory_space<vmem>>, %arg7: memref<1x128xf32, #tpu.memory_space<vmem>>, %arg8: memref<1x128xf32, #tpu.memory_space<vmem>>, %arg9: memref<1x1xf32, #tpu.memory_space<vmem>>, %arg10: memref<1x1x1xf32, #tpu.memory_space<vmem>>) attributes {dimension_semantics = [#tpu.dimension_semantics<parallel>], iteration_bounds = array<i64: 2>, scalar_prefetch = 0 : i64, scratch_operands = 0 : i64, tpu.core_type = #tpu.core_type<tc>, window_params = [{transform_indices = @transform_0, window_bounds = array<i64: 1, 16, 16>}, {pipeline_mode = #tpu.pipeline_mode<synchronous>, transform_indices = @transform_1, window_bounds = array<i64: 48, 256>}, {pipeline_mode = #tpu.pipeline_mode<synchronous>, transform_indices = @transform_2, window_bounds = array<i64: 1, 256>}, {pipeline_mode = #tpu.pipeline_mode<synchronous>, transform_indices = @transform_3, window_bounds = array<i64: 384, 256>}, {pipeline_mode = #tpu.pipeline_mode<synchronous>, transform_indices = @transform_4, window_bounds = array<i64: 1, 256>}, {pipeline_mode = #tpu.pipeline_mode<synchronous>, transform_indices = @transform_5, window_bounds = array<i64: 512, 128>}, {pipeline_mode = #tpu.pipeline_mode<synchronous>, transform_indices = @transform_6, window_bounds = array<i64: 1, 128>}, {pipeline_mode = #tpu.pipeline_mode<synchronous>, transform_indices = @transform_7, window_bounds = array<i64: 1, 128>}, {pipeline_mode = #tpu.pipeline_mode<synchronous>, transform_indices = @transform_8, window_bounds = array<i64: 1, 1>}, {transform_indices = @transform_9, window_bounds = array<i64: 1, 1, 1>}]} {
    %c0 = arith.constant 0 : index
    %c0_0 = arith.constant 0 : index
    %c0_1 = arith.constant 0 : index
    %0 = vector.load %arg1[%c0, %c0_0, %c0_1] : memref<1x16x16xf32, #tpu.memory_space<vmem>>, vector<1x16x16xf32>
    %1 = vector.shape_cast %0 : vector<1x16x16xf32> to vector<16x16xf32>
    %cst = arith.constant 0.000000e+00 : f32
    %2 = vector.broadcast %cst : f32 to vector<1x16xf32>
    %3 = tpu.concatenate %2, %1, %2 in 0 : vector<1x16xf32>, vector<16x16xf32>, vector<1x16xf32> -> vector<18x16xf32>
    %4 = vector.extract_strided_slice %3 {offsets = [0, 0], sizes = [16, 16], strides = [1, 1]} : vector<18x16xf32> to vector<16x16xf32>
    %5 = vector.extract_strided_slice %3 {offsets = [1, 0], sizes = [16, 16], strides = [1, 1]} : vector<18x16xf32> to vector<16x16xf32>
    %6 = vector.extract_strided_slice %3 {offsets = [2, 0], sizes = [16, 16], strides = [1, 1]} : vector<18x16xf32> to vector<16x16xf32>
    %7 = tpu.concatenate %4, %5, %6 in 1 : vector<16x16xf32>, vector<16x16xf32>, vector<16x16xf32> -> vector<16x48xf32>
    %8 = arith.truncf %7 : vector<16x48xf32> to vector<16x48xbf16>
    %c0_2 = arith.constant 0 : index
    %c0_3 = arith.constant 0 : index
    %9 = vector.load %arg2[%c0_2, %c0_3] : memref<48x256xbf16, #tpu.memory_space<vmem>>, vector<48x256xbf16>
    %cst_4 = arith.constant dense<0.000000e+00> : vector<16x256xf32>
    %10 = tpu.matmul %8, %9, %cst_4 {dimension_numbers = #tpu.dot_dimension_numbers<[1], [0], [0], [1], [0, 0, 1, 1], [], []>} : vector<16x48xbf16>, vector<48x256xbf16>, vector<16x256xf32> -> vector<16x256xf32>
    %c0_5 = arith.constant 0 : index
    %c0_6 = arith.constant 0 : index
    %11 = vector.load %arg3[%c0_5, %c0_6] : memref<1x256xf32, #tpu.memory_space<vmem>>, vector<1x256xf32>
    %12 = vector.broadcast %11 : vector<1x256xf32> to vector<16x256xf32>
    %13 = arith.addf %10, %12 : vector<16x256xf32>
    %cst_7 = arith.constant 0.000000e+00 : f32
    %14 = vector.broadcast %cst_7 : f32 to vector<16x256xf32>
    %15 = arith.maximumf %13, %14 : vector<16x256xf32>
    %16 = vector.extract_strided_slice %15 {offsets = [0, 0], sizes = [1, 256], strides = [1, 1]} : vector<16x256xf32> to vector<1x256xf32>
    %17 = vector.extract_strided_slice %15 {offsets = [1, 0], sizes = [1, 256], strides = [1, 1]} : vector<16x256xf32> to vector<1x256xf32>
    %18 = arith.maximumf %16, %17 : vector<1x256xf32>
    %19 = vector.extract_strided_slice %15 {offsets = [1, 0], sizes = [1, 256], strides = [1, 1]} : vector<16x256xf32> to vector<1x256xf32>
    %20 = vector.extract_strided_slice %15 {offsets = [2, 0], sizes = [1, 256], strides = [1, 1]} : vector<16x256xf32> to vector<1x256xf32>
    %21 = arith.maximumf %19, %20 : vector<1x256xf32>
    %22 = vector.extract_strided_slice %15 {offsets = [3, 0], sizes = [1, 256], strides = [1, 1]} : vector<16x256xf32> to vector<1x256xf32>
    %23 = arith.maximumf %21, %22 : vector<1x256xf32>
    %24 = vector.extract_strided_slice %15 {offsets = [3, 0], sizes = [1, 256], strides = [1, 1]} : vector<16x256xf32> to vector<1x256xf32>
    %25 = vector.extract_strided_slice %15 {offsets = [4, 0], sizes = [1, 256], strides = [1, 1]} : vector<16x256xf32> to vector<1x256xf32>
    %26 = arith.maximumf %24, %25 : vector<1x256xf32>
    %27 = vector.extract_strided_slice %15 {offsets = [5, 0], sizes = [1, 256], strides = [1, 1]} : vector<16x256xf32> to vector<1x256xf32>
    %28 = arith.maximumf %26, %27 : vector<1x256xf32>
    %29 = vector.extract_strided_slice %15 {offsets = [5, 0], sizes = [1, 256], strides = [1, 1]} : vector<16x256xf32> to vector<1x256xf32>
    %30 = vector.extract_strided_slice %15 {offsets = [6, 0], sizes = [1, 256], strides = [1, 1]} : vector<16x256xf32> to vector<1x256xf32>
    %31 = arith.maximumf %29, %30 : vector<1x256xf32>
    %32 = vector.extract_strided_slice %15 {offsets = [7, 0], sizes = [1, 256], strides = [1, 1]} : vector<16x256xf32> to vector<1x256xf32>
    %33 = arith.maximumf %31, %32 : vector<1x256xf32>
    %34 = vector.extract_strided_slice %15 {offsets = [7, 0], sizes = [1, 256], strides = [1, 1]} : vector<16x256xf32> to vector<1x256xf32>
    %35 = vector.extract_strided_slice %15 {offsets = [8, 0], sizes = [1, 256], strides = [1, 1]} : vector<16x256xf32> to vector<1x256xf32>
    %36 = arith.maximumf %34, %35 : vector<1x256xf32>
    %37 = vector.extract_strided_slice %15 {offsets = [9, 0], sizes = [1, 256], strides = [1, 1]} : vector<16x256xf32> to vector<1x256xf32>
    %38 = arith.maximumf %36, %37 : vector<1x256xf32>
    %39 = vector.extract_strided_slice %15 {offsets = [9, 0], sizes = [1, 256], strides = [1, 1]} : vector<16x256xf32> to vector<1x256xf32>
    %40 = vector.extract_strided_slice %15 {offsets = [10, 0], sizes = [1, 256], strides = [1, 1]} : vector<16x256xf32> to vector<1x256xf32>
    %41 = arith.maximumf %39, %40 : vector<1x256xf32>
    %42 = vector.extract_strided_slice %15 {offsets = [11, 0], sizes = [1, 256], strides = [1, 1]} : vector<16x256xf32> to vector<1x256xf32>
    %43 = arith.maximumf %41, %42 : vector<1x256xf32>
    %44 = vector.extract_strided_slice %15 {offsets = [11, 0], sizes = [1, 256], strides = [1, 1]} : vector<16x256xf32> to vector<1x256xf32>
    %45 = vector.extract_strided_slice %15 {offsets = [12, 0], sizes = [1, 256], strides = [1, 1]} : vector<16x256xf32> to vector<1x256xf32>
    %46 = arith.maximumf %44, %45 : vector<1x256xf32>
    %47 = vector.extract_strided_slice %15 {offsets = [13, 0], sizes = [1, 256], strides = [1, 1]} : vector<16x256xf32> to vector<1x256xf32>
    %48 = arith.maximumf %46, %47 : vector<1x256xf32>
    %49 = vector.extract_strided_slice %15 {offsets = [13, 0], sizes = [1, 256], strides = [1, 1]} : vector<16x256xf32> to vector<1x256xf32>
    %50 = vector.extract_strided_slice %15 {offsets = [14, 0], sizes = [1, 256], strides = [1, 1]} : vector<16x256xf32> to vector<1x256xf32>
    %51 = arith.maximumf %49, %50 : vector<1x256xf32>
    %52 = vector.extract_strided_slice %15 {offsets = [15, 0], sizes = [1, 256], strides = [1, 1]} : vector<16x256xf32> to vector<1x256xf32>
    %53 = arith.maximumf %51, %52 : vector<1x256xf32>
    %54 = tpu.concatenate %18, %23, %28, %33, %38, %43, %48, %53 in 0 : vector<1x256xf32>, vector<1x256xf32>, vector<1x256xf32>, vector<1x256xf32>, vector<1x256xf32>, vector<1x256xf32>, vector<1x256xf32>, vector<1x256xf32> -> vector<8x256xf32>
    %55 = vector.extract_strided_slice %54 {offsets = [0, 0], sizes = [8, 16], strides = [1, 1]} : vector<8x256xf32> to vector<8x16xf32>
    %56 = vector.extract_strided_slice %54 {offsets = [0, 16], sizes = [8, 16], strides = [1, 1]} : vector<8x256xf32> to vector<8x16xf32>
    %57 = arith.maximumf %55, %56 : vector<8x16xf32>
    %58 = vector.extract_strided_slice %54 {offsets = [0, 16], sizes = [8, 16], strides = [1, 1]} : vector<8x256xf32> to vector<8x16xf32>
    %59 = vector.extract_strided_slice %54 {offsets = [0, 32], sizes = [8, 16], strides = [1, 1]} : vector<8x256xf32> to vector<8x16xf32>
    %60 = arith.maximumf %58, %59 : vector<8x16xf32>
    %61 = vector.extract_strided_slice %54 {offsets = [0, 48], sizes = [8, 16], strides = [1, 1]} : vector<8x256xf32> to vector<8x16xf32>
    %62 = arith.maximumf %60, %61 : vector<8x16xf32>
    %63 = vector.extract_strided_slice %54 {offsets = [0, 48], sizes = [8, 16], strides = [1, 1]} : vector<8x256xf32> to vector<8x16xf32>
    %64 = vector.extract_strided_slice %54 {offsets = [0, 64], sizes = [8, 16], strides = [1, 1]} : vector<8x256xf32> to vector<8x16xf32>
    %65 = arith.maximumf %63, %64 : vector<8x16xf32>
    %66 = vector.extract_strided_slice %54 {offsets = [0, 80], sizes = [8, 16], strides = [1, 1]} : vector<8x256xf32> to vector<8x16xf32>
    %67 = arith.maximumf %65, %66 : vector<8x16xf32>
    %68 = vector.extract_strided_slice %54 {offsets = [0, 80], sizes = [8, 16], strides = [1, 1]} : vector<8x256xf32> to vector<8x16xf32>
    %69 = vector.extract_strided_slice %54 {offsets = [0, 96], sizes = [8, 16], strides = [1, 1]} : vector<8x256xf32> to vector<8x16xf32>
    %70 = arith.maximumf %68, %69 : vector<8x16xf32>
    %71 = vector.extract_strided_slice %54 {offsets = [0, 112], sizes = [8, 16], strides = [1, 1]} : vector<8x256xf32> to vector<8x16xf32>
    %72 = arith.maximumf %70, %71 : vector<8x16xf32>
    %73 = vector.extract_strided_slice %54 {offsets = [0, 112], sizes = [8, 16], strides = [1, 1]} : vector<8x256xf32> to vector<8x16xf32>
    %74 = vector.extract_strided_slice %54 {offsets = [0, 128], sizes = [8, 16], strides = [1, 1]} : vector<8x256xf32> to vector<8x16xf32>
    %75 = arith.maximumf %73, %74 : vector<8x16xf32>
    %76 = vector.extract_strided_slice %54 {offsets = [0, 144], sizes = [8, 16], strides = [1, 1]} : vector<8x256xf32> to vector<8x16xf32>
    %77 = arith.maximumf %75, %76 : vector<8x16xf32>
    %78 = vector.extract_strided_slice %54 {offsets = [0, 144], sizes = [8, 16], strides = [1, 1]} : vector<8x256xf32> to vector<8x16xf32>
    %79 = vector.extract_strided_slice %54 {offsets = [0, 160], sizes = [8, 16], strides = [1, 1]} : vector<8x256xf32> to vector<8x16xf32>
    %80 = arith.maximumf %78, %79 : vector<8x16xf32>
    %81 = vector.extract_strided_slice %54 {offsets = [0, 176], sizes = [8, 16], strides = [1, 1]} : vector<8x256xf32> to vector<8x16xf32>
    %82 = arith.maximumf %80, %81 : vector<8x16xf32>
    %83 = vector.extract_strided_slice %54 {offsets = [0, 176], sizes = [8, 16], strides = [1, 1]} : vector<8x256xf32> to vector<8x16xf32>
    %84 = vector.extract_strided_slice %54 {offsets = [0, 192], sizes = [8, 16], strides = [1, 1]} : vector<8x256xf32> to vector<8x16xf32>
    %85 = arith.maximumf %83, %84 : vector<8x16xf32>
    %86 = vector.extract_strided_slice %54 {offsets = [0, 208], sizes = [8, 16], strides = [1, 1]} : vector<8x256xf32> to vector<8x16xf32>
    %87 = arith.maximumf %85, %86 : vector<8x16xf32>
    %88 = vector.extract_strided_slice %54 {offsets = [0, 208], sizes = [8, 16], strides = [1, 1]} : vector<8x256xf32> to vector<8x16xf32>
    %89 = vector.extract_strided_slice %54 {offsets = [0, 224], sizes = [8, 16], strides = [1, 1]} : vector<8x256xf32> to vector<8x16xf32>
    %90 = arith.maximumf %88, %89 : vector<8x16xf32>
    %91 = vector.extract_strided_slice %54 {offsets = [0, 240], sizes = [8, 16], strides = [1, 1]} : vector<8x256xf32> to vector<8x16xf32>
    %92 = arith.maximumf %90, %91 : vector<8x16xf32>
    %93 = tpu.concatenate %57, %62, %67, %72, %77, %82, %87, %92 in 1 : vector<8x16xf32>, vector<8x16xf32>, vector<8x16xf32>, vector<8x16xf32>, vector<8x16xf32>, vector<8x16xf32>, vector<8x16xf32>, vector<8x16xf32> -> vector<8x128xf32>
    %cst_8 = arith.constant 0.000000e+00 : f32
    %94 = vector.broadcast %cst_8 : f32 to vector<1x128xf32>
    %95 = tpu.concatenate %94, %93, %94 in 0 : vector<1x128xf32>, vector<8x128xf32>, vector<1x128xf32> -> vector<10x128xf32>
    %96 = vector.extract_strided_slice %95 {offsets = [0, 0], sizes = [8, 128], strides = [1, 1]} : vector<10x128xf32> to vector<8x128xf32>
    %97 = vector.extract_strided_slice %95 {offsets = [1, 0], sizes = [8, 128], strides = [1, 1]} : vector<10x128xf32> to vector<8x128xf32>
    %98 = vector.extract_strided_slice %95 {offsets = [2, 0], sizes = [8, 128], strides = [1, 1]} : vector<10x128xf32> to vector<8x128xf32>
    %99 = tpu.concatenate %96, %97, %98 in 1 : vector<8x128xf32>, vector<8x128xf32>, vector<8x128xf32> -> vector<8x384xf32>
    %100 = arith.truncf %99 : vector<8x384xf32> to vector<8x384xbf16>
    %c0_9 = arith.constant 0 : index
    %c0_10 = arith.constant 0 : index
    %101 = vector.load %arg4[%c0_9, %c0_10] : memref<384x256xbf16, #tpu.memory_space<vmem>>, vector<384x256xbf16>
    %cst_11 = arith.constant dense<0.000000e+00> : vector<8x256xf32>
    %102 = tpu.matmul %100, %101, %cst_11 {dimension_numbers = #tpu.dot_dimension_numbers<[1], [0], [0], [1], [0, 0, 1, 1], [], []>} : vector<8x384xbf16>, vector<384x256xbf16>, vector<8x256xf32> -> vector<8x256xf32>
    %c0_12 = arith.constant 0 : index
    %c0_13 = arith.constant 0 : index
    %103 = vector.load %arg5[%c0_12, %c0_13] : memref<1x256xf32, #tpu.memory_space<vmem>>, vector<1x256xf32>
    %104 = vector.broadcast %103 : vector<1x256xf32> to vector<8x256xf32>
    %105 = arith.addf %102, %104 : vector<8x256xf32>
    %cst_14 = arith.constant 0.000000e+00 : f32
    %106 = vector.broadcast %cst_14 : f32 to vector<8x256xf32>
    %107 = arith.maximumf %105, %106 : vector<8x256xf32>
    %108 = vector.extract_strided_slice %107 {offsets = [0, 0], sizes = [1, 256], strides = [1, 1]} : vector<8x256xf32> to vector<1x256xf32>
    %109 = vector.extract_strided_slice %107 {offsets = [1, 0], sizes = [1, 256], strides = [1, 1]} : vector<8x256xf32> to vector<1x256xf32>
    %110 = arith.maximumf %108, %109 : vector<1x256xf32>
    %111 = vector.extract_strided_slice %107 {offsets = [1, 0], sizes = [1, 256], strides = [1, 1]} : vector<8x256xf32> to vector<1x256xf32>
    %112 = vector.extract_strided_slice %107 {offsets = [2, 0], sizes = [1, 256], strides = [1, 1]} : vector<8x256xf32> to vector<1x256xf32>
    %113 = arith.maximumf %111, %112 : vector<1x256xf32>
    %114 = vector.extract_strided_slice %107 {offsets = [3, 0], sizes = [1, 256], strides = [1, 1]} : vector<8x256xf32> to vector<1x256xf32>
    %115 = arith.maximumf %113, %114 : vector<1x256xf32>
    %116 = vector.extract_strided_slice %107 {offsets = [3, 0], sizes = [1, 256], strides = [1, 1]} : vector<8x256xf32> to vector<1x256xf32>
    %117 = vector.extract_strided_slice %107 {offsets = [4, 0], sizes = [1, 256], strides = [1, 1]} : vector<8x256xf32> to vector<1x256xf32>
    %118 = arith.maximumf %116, %117 : vector<1x256xf32>
    %119 = vector.extract_strided_slice %107 {offsets = [5, 0], sizes = [1, 256], strides = [1, 1]} : vector<8x256xf32> to vector<1x256xf32>
    %120 = arith.maximumf %118, %119 : vector<1x256xf32>
    %121 = vector.extract_strided_slice %107 {offsets = [5, 0], sizes = [1, 256], strides = [1, 1]} : vector<8x256xf32> to vector<1x256xf32>
    %122 = vector.extract_strided_slice %107 {offsets = [6, 0], sizes = [1, 256], strides = [1, 1]} : vector<8x256xf32> to vector<1x256xf32>
    %123 = arith.maximumf %121, %122 : vector<1x256xf32>
    %124 = vector.extract_strided_slice %107 {offsets = [7, 0], sizes = [1, 256], strides = [1, 1]} : vector<8x256xf32> to vector<1x256xf32>
    %125 = arith.maximumf %123, %124 : vector<1x256xf32>
    %126 = tpu.concatenate %110, %115, %120, %125 in 0 : vector<1x256xf32>, vector<1x256xf32>, vector<1x256xf32>, vector<1x256xf32> -> vector<4x256xf32>
    %127 = vector.extract_strided_slice %126 {offsets = [0, 0], sizes = [4, 32], strides = [1, 1]} : vector<4x256xf32> to vector<4x32xf32>
    %128 = vector.extract_strided_slice %126 {offsets = [0, 32], sizes = [4, 32], strides = [1, 1]} : vector<4x256xf32> to vector<4x32xf32>
    %129 = arith.maximumf %127, %128 : vector<4x32xf32>
    %130 = vector.extract_strided_slice %126 {offsets = [0, 32], sizes = [4, 32], strides = [1, 1]} : vector<4x256xf32> to vector<4x32xf32>
    %131 = vector.extract_strided_slice %126 {offsets = [0, 64], sizes = [4, 32], strides = [1, 1]} : vector<4x256xf32> to vector<4x32xf32>
    %132 = arith.maximumf %130, %131 : vector<4x32xf32>
    %133 = vector.extract_strided_slice %126 {offsets = [0, 96], sizes = [4, 32], strides = [1, 1]} : vector<4x256xf32> to vector<4x32xf32>
    %134 = arith.maximumf %132, %133 : vector<4x32xf32>
    %135 = vector.extract_strided_slice %126 {offsets = [0, 96], sizes = [4, 32], strides = [1, 1]} : vector<4x256xf32> to vector<4x32xf32>
    %136 = vector.extract_strided_slice %126 {offsets = [0, 128], sizes = [4, 32], strides = [1, 1]} : vector<4x256xf32> to vector<4x32xf32>
    %137 = arith.maximumf %135, %136 : vector<4x32xf32>
    %138 = vector.extract_strided_slice %126 {offsets = [0, 160], sizes = [4, 32], strides = [1, 1]} : vector<4x256xf32> to vector<4x32xf32>
    %139 = arith.maximumf %137, %138 : vector<4x32xf32>
    %140 = vector.extract_strided_slice %126 {offsets = [0, 160], sizes = [4, 32], strides = [1, 1]} : vector<4x256xf32> to vector<4x32xf32>
    %141 = vector.extract_strided_slice %126 {offsets = [0, 192], sizes = [4, 32], strides = [1, 1]} : vector<4x256xf32> to vector<4x32xf32>
    %142 = arith.maximumf %140, %141 : vector<4x32xf32>
    %143 = vector.extract_strided_slice %126 {offsets = [0, 224], sizes = [4, 32], strides = [1, 1]} : vector<4x256xf32> to vector<4x32xf32>
    %144 = arith.maximumf %142, %143 : vector<4x32xf32>
    %145 = tpu.concatenate %129, %134, %139, %144 in 1 : vector<4x32xf32>, vector<4x32xf32>, vector<4x32xf32>, vector<4x32xf32> -> vector<4x128xf32>
    %146 = vector.extract_strided_slice %145 {offsets = [0, 0], sizes = [1, 128], strides = [1, 1]} : vector<4x128xf32> to vector<1x128xf32>
    %147 = vector.extract_strided_slice %145 {offsets = [1, 0], sizes = [1, 128], strides = [1, 1]} : vector<4x128xf32> to vector<1x128xf32>
    %148 = vector.extract_strided_slice %145 {offsets = [2, 0], sizes = [1, 128], strides = [1, 1]} : vector<4x128xf32> to vector<1x128xf32>
    %149 = vector.extract_strided_slice %145 {offsets = [3, 0], sizes = [1, 128], strides = [1, 1]} : vector<4x128xf32> to vector<1x128xf32>
    %150 = tpu.concatenate %146, %147, %148, %149 in 1 : vector<1x128xf32>, vector<1x128xf32>, vector<1x128xf32>, vector<1x128xf32> -> vector<1x512xf32>
    %151 = arith.truncf %150 : vector<1x512xf32> to vector<1x512xbf16>
    %c0_15 = arith.constant 0 : index
    %c0_16 = arith.constant 0 : index
    %152 = vector.load %arg6[%c0_15, %c0_16] : memref<512x128xbf16, #tpu.memory_space<vmem>>, vector<512x128xbf16>
    %cst_17 = arith.constant dense<0.000000e+00> : vector<1x128xf32>
    %153 = tpu.matmul %151, %152, %cst_17 {dimension_numbers = #tpu.dot_dimension_numbers<[1], [0], [0], [1], [0, 0, 1, 1], [], []>} : vector<1x512xbf16>, vector<512x128xbf16>, vector<1x128xf32> -> vector<1x128xf32>
    %c0_18 = arith.constant 0 : index
    %c0_19 = arith.constant 0 : index
    %154 = vector.load %arg7[%c0_18, %c0_19] : memref<1x128xf32, #tpu.memory_space<vmem>>, vector<1x128xf32>
    %155 = arith.addf %153, %154 : vector<1x128xf32>
    %cst_20 = arith.constant 0.000000e+00 : f32
    %156 = vector.broadcast %cst_20 : f32 to vector<1x128xf32>
    %157 = arith.maximumf %155, %156 : vector<1x128xf32>
    %c0_21 = arith.constant 0 : index
    %c0_22 = arith.constant 0 : index
    %158 = vector.load %arg8[%c0_21, %c0_22] : memref<1x128xf32, #tpu.memory_space<vmem>>, vector<1x128xf32>
    %159 = arith.mulf %157, %158 : vector<1x128xf32>
    %cst_23 = arith.constant dense<0.000000e+00> : vector<1xf32>
    %160 = vector.multi_reduction <add>, %159, %cst_23 [1] : vector<1x128xf32> to vector<1xf32>
    %161 = vector.shape_cast %160 : vector<1xf32> to vector<1x1xf32>
    %c0_24 = arith.constant 0 : index
    %c0_25 = arith.constant 0 : index
    %162 = vector.load %arg9[%c0_24, %c0_25] : memref<1x1xf32, #tpu.memory_space<vmem>>, vector<1x1xf32>
    %163 = arith.addf %161, %162 : vector<1x1xf32>
    %c0_26 = arith.constant 0 : index
    %c0_27 = arith.constant 0 : index
    %c0_28 = arith.constant 0 : index
    %164 = vector.load %arg10[%c0_26, %c0_27, %c0_28] : memref<1x1x1xf32, #tpu.memory_space<vmem>>, vector<1x1x1xf32>
    %165 = vector.shape_cast %164 : vector<1x1x1xf32> to vector<1x1xf32>
    %166 = vector.shape_cast %163 : vector<1x1xf32> to vector<1x1x1xf32>
    tpu.vector_store %arg10[%c0_26, %c0_27, %c0_28], %166 {strides = array<i32>} : memref<1x1x1xf32, #tpu.memory_space<vmem>>, vector<1x1x1xf32>,
    return
  }
  func.func @transform_0(%arg0: i32) -> (i32, i32, i32) {
    %c0_i32 = arith.constant 0 : i32
    %c0_i32_0 = arith.constant 0 : i32
    %c0_i32_1 = arith.constant 0 : i32
    return %arg0, %c0_i32, %c0_i32_0 : i32, i32, i32
  }
  func.func @transform_1(%arg0: i32) -> (i32, i32) {
    %c0_i32 = arith.constant 0 : i32
    %c0_i32_0 = arith.constant 0 : i32
    %c0_i32_1 = arith.constant 0 : i32
    return %c0_i32, %c0_i32_0 : i32, i32
  }
  func.func @transform_2(%arg0: i32) -> (i32, i32) {
    %c0_i32 = arith.constant 0 : i32
    %c0_i32_0 = arith.constant 0 : i32
    %c0_i32_1 = arith.constant 0 : i32
    return %c0_i32, %c0_i32_0 : i32, i32
  }
  func.func @transform_3(%arg0: i32) -> (i32, i32) {
    %c0_i32 = arith.constant 0 : i32
    %c0_i32_0 = arith.constant 0 : i32
    %c0_i32_1 = arith.constant 0 : i32
    return %c0_i32, %c0_i32_0 : i32, i32
  }
  func.func @transform_4(%arg0: i32) -> (i32, i32) {
    %c0_i32 = arith.constant 0 : i32
    %c0_i32_0 = arith.constant 0 : i32
    %c0_i32_1 = arith.constant 0 : i32
    return %c0_i32, %c0_i32_0 : i32, i32
  }
  func.func @transform_5(%arg0: i32) -> (i32, i32) {
    %c0_i32 = arith.constant 0 : i32
    %c0_i32_0 = arith.constant 0 : i32
    %c0_i32_1 = arith.constant 0 : i32
    return %c0_i32, %c0_i32_0 : i32, i32
  }
  func.func @transform_6(%arg0: i32) -> (i32, i32) {
    %c0_i32 = arith.constant 0 : i32
    %c0_i32_0 = arith.constant 0 : i32
    %c0_i32_1 = arith.constant 0 : i32
    return %c0_i32, %c0_i32_0 : i32, i32
  }
  func.func @transform_7(%arg0: i32) -> (i32, i32) {
    %c0_i32 = arith.constant 0 : i32
    %c0_i32_0 = arith.constant 0 : i32
    %c0_i32_1 = arith.constant 0 : i32
    return %c0_i32, %c0_i32_0 : i32, i32
  }
  func.func @transform_8(%arg0: i32) -> (i32, i32) {
    %c0_i32 = arith.constant 0 : i32
    %c0_i32_0 = arith.constant 0 : i32
    %c0_i32_1 = arith.constant 0 : i32
    return %c0_i32, %c0_i32_0 : i32, i32
  }
  func.func @transform_9(%arg0: i32) -> (i32, i32, i32) {
    %c0_i32 = arith.constant 0 : i32
    %c0_i32_0 = arith.constant 0 : i32
    %c0_i32_1 = arith.constant 0 : i32
    return %arg0, %c0_i32, %c0_i32_0 : i32, i32, i32
  }
}

</mosaic_0001>

<bundles_post_ra>
// kernel: _lambda_.1
= control target key start
LH: loop header
LB: loop body
LE: loop exit
PB: predicated region body
PF: predicated region fallthrough
CT: control target
= control target key end

     0   :  { %s2599_s0 = inlined_call_operand.hbm [shape: f32[2,16,16], index: 0, kind: input, shape index: {}]   ;;  %s2600_s1 = inlined_call_operand.hbm [shape: bf16[48,256], index: 1, kind: input, shape index: {}]   ;;  %s2601_s2 = inlined_call_operand.hbm [shape: f32[1,256], index: 2, kind: input, shape index: {}]   ;;  %s2602_s3 = inlined_call_operand.hbm [shape: bf16[384,256], index: 3, kind: input, shape index: {}]   ;;  %s2603_s4 = inlined_call_operand.vmem [shape: f32[1,256], index: 4, kind: input, shape index: {}]   ;;  %s2604_s5 = inlined_call_operand.hbm [shape: bf16[512,128], index: 5, kind: input, shape index: {}]   ;;  %s2605_s6 = inlined_call_operand.vmem [shape: f32[1,128], index: 6, kind: input, shape index: {}]   ;;  %s2606_s7 = inlined_call_operand.vmem [shape: f32[1,128], index: 7, kind: input, shape index: {}]   ;;  %s2607_s8 = inlined_call_operand.<no memory space> [shape: f32[1,1], index: 8, kind: input, shape index: {}]   ;;  %s2608_s9 = inlined_call_operand.vmem [shape: f32[2,1,1], index: 9, kind: output, shape index: {}]  }
   0x1   :  { %v14_v0 = vstv %s2607_s8 }
   0x2   :  { %15 = vst [vmem:[#allocation2] sm:$0x1] %v14_v0 }
   0x3   :  { %16 = vsyncpa [#allocation4], 0 }
   0x4   :  { %18 = vsyncpa [#allocation4 + $0x1], 0 }
   0x5   :  { %19 = vsyncpa [#allocation6], 0 }
   0x6   :  { %20 = vsyncpa [#allocation9], 0  ;;  %s2388_s11 = smov 0   ;;  %s2390_s12 = smov 0  }
   0x7   :  { %s2392_s13 = smov 0   ;;  %s2394_s14 = smov 0  }
   0x8 LB: > { %s2407_s8 = sadd.s32 4294967295, %s2318_s14   ;;  %p46_p0 = scmp.ne.s32.totalorder %s2310_s12, %s2306_s11  ;;  %s2318_s14 = sphi %s2394_s14, %s2618_s14   ;;  %s2314_s13 = sphi %s2392_s13, %s2617_s13   ;;  %s2310_s12 = sphi %s2390_s12, %s2616_s12   ;;  %s2306_s11 = sphi %s2388_s11, %s2615_s11  }
   0x9   : > { %p47_p1 = scmp.eq.s32.totalorder %s2407_s8, 0  ;;  %p1555_p2 = scmp.ge.s32.totalorder %s2318_s14, 1 }
   0xa   : > { %p251_p3 = scmp.lt.s32.totalorder %s2318_s14, 3  ;;  %s262_s18 = sshll.u32 %s2600_s1, 4  ;;  %s263_s18 = int_to_ptr.hbm [resolvable:$true] %s262_s18 }
   0xb   : > { %p2415_p4 = por %p47_p1, %p46_p0  ;;  %s2320_s20 = smov [#allocation5]  }
   0xc   : > { %p2422_p5 = pnand %p1555_p2, %p251_p3  ;;  %s264_s21 = sshll.u32 %s2320_s20, 4  ;;  %s265_s21 = int_to_ptr.vmem [resolvable:$true] %s264_s21 }
   0xd   : > { %s288_s25 = sshll.u32 %s2602_s3, 4  ;;  %s2609_s26 = smov 128   ;;  %s289_s25 = int_to_ptr.hbm [resolvable:$true] %s288_s25 }
   0xe   : > { %p2033_p6 = pneg %p2422_p5  ;;  %s2322_s27 = smov 8  }
   0xf   : > { %s2323_s28 = smov [#allocation8]   ;;  %s277_s11 = sshll.u32 %s2601_s2, 4  ;;  %s278_s11 = int_to_ptr.hbm [resolvable:$true] %s277_s11 }
  0x10   : > { %p2430_p7 = pnand %p2033_p6, %p47_p1  ;;  %s290_s29 = sshll.u32 %s2323_s28, 4  ;;  %s291_s29 = int_to_ptr.vmem [resolvable:$true] %s290_s29 }
  0x11   : > { %s2324_s20 = smov [#allocation7]   ;;  %s2325_s23 = smov [#allocation10]  }
  0x12   : > { %2036 = dma.hbm_to_vmem [thread:$0]  (!%p2430_p7), %s263_s18, 768, %s265_s21, [#allocation6], %s2609_s26, %s2609_s26, %s2322_s27  }
  0x13   : > { %2042 = dma.hbm_to_vmem [thread:$0]  (!%p2430_p7), %s289_s25, 6144, %s291_s29, [#allocation9], %s2609_s26, %s2609_s26, %s2322_s27  }
  0x14   : > { %s305_s18 = sshll.u32 %s2604_s5, 4  ;;  %s279_s21 = sshll.u32 %s2324_s20, 4  ;;  %s306_s18 = int_to_ptr.hbm [resolvable:$true] %s305_s18  ;;  %s280_s21 = int_to_ptr.vmem [resolvable:$true] %s279_s21 }
  0x15   : > { %2039 = dma.hbm_to_vmem [thread:$0]  (!%p2430_p7), %s278_s11, 32, %s280_s21, [#allocation6]  }
  0x16   : > { %s307_s24 = sshll.u32 %s2325_s23, 4  ;;  %s2326_s25 = smov 64   ;;  %s308_s24 = int_to_ptr.vmem [resolvable:$true] %s307_s24 }
  0x17   : > { %s2327_s28 = smov 4   ;;  %s2458_s29 = sadd.s32 1, %s2318_s14  }
  0x18   : > { %2045 = dma.hbm_to_vmem [thread:$0]  (!%p2430_p7), %s306_s18, 4096, %s308_s24, [#allocation9], %s2326_s25, %s2326_s25, %s2327_s28  }
  0x19   : > { %s30_s30 = ssub.s32 %s2318_s14, %s2458_s29  ;;  %s33_s10 = sadd.s32 1, %s2314_s13 }
  0x1a   : > { %p31_p8 = scmp.eq.s32.totalorder %s30_s30, 0  ;;  %p40_p9 = scmp.ne.s32.totalorder %s2314_s13, %s2310_s12 }
  0x1b   : > { %p41_p10 = scmp.eq.s32.totalorder %s2318_s14, 0  ;;  %s330_s11 = sand.u32 1, %s2314_s13  }
  0x1c   : > { %s2467_s16 = scalar_select %p31_p8, %s2314_s13, %s33_s10  }
  0x1d   : > { %p42_p11 = por %p41_p10, %p40_p9  ;;  %s1928_s17 = sshll.u32 %s2318_s14, 4 }
  0x1e   : > { %p2054_p12 = scmp.lt.s32.totalorder %s2318_s14, 2  ;;  %s1561_s20 = sshll.u32 %s330_s11, 4 }
  0x1f   : > { %s339_s22 = scalar_lea.hbm %s2599_s0, %s1928_s17  ;;  %s334_s24 = scalar_lea.vmem [#allocation3], %s1561_s20 }
  0x20   : > { %s340_s18 = sshll.u32 %s339_s22, 4  ;;  %s342_s25 = sshll.u32 %s334_s24, 4  ;;  %s341_s18 = int_to_ptr.hbm [resolvable:$true] %s340_s18  ;;  %s343_s25 = int_to_ptr.vmem [resolvable:$true] %s342_s25 }
  0x21   : > { %p2475_p13 = pnand %p2054_p12, %p42_p11  ;;  %s331_s30 = scalar_lea.sflag [#allocation4], %s330_s11 }
  0x22   : > { %s2246_s10 = sshra.s32 %s341_s18, 4  ;;  %s2253_s20 = scalar_lea.hbm %s2599_s0, 32  ;;  %s2247_s10 = int_to_ptr.hbm [resolvable:$true] %s2246_s10 }
  0x23   : > { %s2248_s26 = scalar_lea.hbm %s2247_s10, 16  ;;  %p2250_p2 = pneg %p2475_p13 }
  0x24   : > { %p2249_p0 = scmp.ne.s32.totalorder %s2247_s10, %s2248_s26  ;;  %p2254_p7 = scmp.lt.s32.totalorder %s2247_s10, %s2599_s0 }
  0x25   : > { %p2255_p8 = scmp.lt.s32.totalorder %s2253_s20, %s2248_s26 }
  0x26   : > { %p2251_p3 = pnand %p2250_p2, %p2249_p0 }
  0x27   : > { %p2256_p9 = por %p2255_p8, %p2254_p7 }
  0x28   : > { %p2252_p6 = pneg %p2251_p3 }
  0x2a   : > { %p2257_p10 = pnand %p2256_p9, %p2252_p6 }
  0x2c   : > { %2260 = shalt.err (!%p2257_p10)
}
  0x2d   : > { %s2614_s11 = smov 128   ;;  %354 = sbr.rel (%p2422_p5) target bundleno = 1264 (0x4f0), region = 56 }
  0x2e   : > { %2049 = dma.hbm_to_vmem [thread:$0]  (!%p2475_p13), %s341_s18, 256, %s343_s25, %s331_s30, %s2614_s11, %s2614_s11, %s2322_s27  }
  0x2f   : > { %s356_s22 = sand.u32 (!%p2422_p5), 1, %s2310_s12  }
  0x30   : > { %s1565_s24 = sshll.u32 (!%p2422_p5), %s356_s22, 4  ;;  %s357_s14 = scalar_lea.sflag (!%p2422_p5), [#allocation4], %s356_s22 }
  0x31   : > { %s360_s17 = scalar_lea.vmem (!%p2422_p5), [#allocation3], %s1565_s24 }
  0x32   : > { %2293 = dma.done.wait (%p2415_p4), %s357_s14, 256  }
  0x33   : > { %2295 = vsyncadd (%p2415_p4), %s357_s14, 4294967040 }
  0x34   : > { %2297 = dma.done.wait (%p47_p1), [#allocation6], 800  }
  0x35   : > { %2299 = vsyncadd (%p47_p1), [#allocation6], 4294966496 }
  0x36   : > { %2301 = dma.done.wait (%p47_p1), [#allocation9], 10240  }
  0x37   : > { %2303 = vsyncadd (%p47_p1), [#allocation9], 4294957056  ;;  %v418_v1 = vld [vmem:[%s360_s17] sm:$0xff]  ;;  %v419_v2 = vld [vmem:[%s360_s17 + $0x8] sm:$0xff]  ;;  %vm422_vm0 = vcmask 1040384   ;;  %vm433_vm1 = vcmask 1046528  }
  0x38   : > { %v423_v3 = vrot.slane %v418_v1, 7  ;;  %v424_v4 = vrot.slane %v419_v2, 7  ;;  %vm445_vm2 = vcmask 1045504   ;;  %s2328_s15 = smov 16   ;;  %s2329_s19 = smov 32   ;;  %vm457_vm3 = vcmask 130048   ;;  %vm1788_vm14 = vmneg %vm422_vm0 }
  0x39   : > { %v1588_v20 = vld [vmem:[#allocation5 + $0x20] sm:$0xf]  ;;  %v1934_v21 = vld [vmem:[#allocation5 + $0x24] sm:$0xf0]  ;;  %v1933_v22 = vld [vmem:[#allocation5 + $0x24] sm:$0xf] }
  0x3a   : > { %v425_v5 = vsel %vm422_vm0, %v423_v3, %v424_v4  ;;  %v429_v6 = vsel %vm422_vm0, 0.0, %v423_v3  ;;  %v430_v7 = vsel %vm422_vm0, %v424_v4, 0.0  ;;  %v1589_v23 = vor.u32 %v1934_v21, %v1588_v20  ;;  %v1590_v24 = vld [vmem:[#allocation5 + $0x28] sm:$0xf0]  ;;  %v1580_v26 = vld [vmem:[#allocation5 + $0x10] sm:$0xf]  ;;  %vm1790_vm15 = vmpackc.low %vm1788_vm14, %vm1788_vm14 }
  0x3b   : > { %v434_v8 = vrot.slane %v429_v6, 1  ;;  %v435_v9 = vrot.slane %v425_v5, 1  ;;  %v437_v10 = vrot.slane %v430_v7, 1  ;;  %v449_v11 = vrot.slane %v430_v7, 2  ;;  %v1932_v27 = vld [vmem:[#allocation5 + $0x14] sm:$0xf0] }
  0x3c   : > { %v446_v14 = vrot.slane %v429_v6, 2  ;;  %v447_v15 = vrot.slane %v425_v5, 2  ;;  %v1593_v25 = vor.u32 %v1933_v22, %v1590_v24  ;;  %515 = vmatpush.bf16.msra.mxu0 %v1589_v23  ;;  %v1931_v28 = vld [vmem:[#allocation5 + $0x14] sm:$0xf]  ;;  %v1581_v29 = vor.u32 %v1932_v27, %v1580_v26  ;;  %v1582_v30 = vld [vmem:[#allocation5 + $0x18] sm:$0xf0] }
  0x3d   : > { %v436_v12 = vsel %vm433_vm1, %v434_v8, %v435_v9  ;;  %v438_v13 = vsel %vm433_vm1, %v435_v9, %v437_v10  ;;  %v1585_v31 = vor.u32 %v1931_v28, %v1582_v30  ;;  %v1572_v32 = vld [vmem:[#allocation5] sm:$0xf]  ;;  %v1930_v33 = vld [vmem:[#allocation5 + $0x4] sm:$0xf0]  ;;  %v1929_v34 = vld [vmem:[#allocation5 + $0x4] sm:$0xf] }
  0x3e   : > { %v2106_v16 = vpack.i.bf16 %v438_v13, %v436_v12  ;;  %v448_v17 = vsel %vm445_vm2, %v446_v14, %v447_v15  ;;  %v450_v18 = vsel %vm445_vm2, %v447_v15, %v449_v11  ;;  %529 = vmatpush.bf16.msra.mxu1 %v1593_v25  ;;  %v1573_v35 = vor.u32 %v1930_v33, %v1572_v32  ;;  %v1574_v36 = vld [vmem:[#allocation5 + $0x8] sm:$0xf0]  ;;  %v470_v49 = vld [vmem:[#allocation7] sm:$0x3]  ;;  %s2330_s26 = smov 112   ;;  %s2331_s27 = smov 96  }
  0x3f   : > { %v2111_v19 = vpack.i.bf16 %v450_v18, %v448_v17  ;;  %v1577_v37 = vor.u32 %v1929_v34, %v1574_v36  ;;  %vm460_vm4 = vcmask 261120   ;;  %vm506_vm5 = vcmask 392192   ;;  %s2332_s18 = smov 64   ;;  %s2333_s25 = smov 80  }
  0x40   : > { %2107 = vrot.lane.b32.xlu0 %v2106_v16, %s2328_s15  ;;  %516 = vmatpush.bf16.msra.mxu0 %v1581_v29  ;;  %v472_v50 = vperm.slane %v470_v49, 0  ;;  %v473_v51 = vperm.slane %v470_v49, 1  ;;  %vm606_vm6 = vcmask 1041408   ;;  %vm609_vm7 = vcmask 1042432   ;;  %v1646_v49 = vld [vmem:[#allocation8 + $0x60] sm:$0xf] }
  0x41   : > { %vm612_vm8 = vcmask 1043456   ;;  %vm615_vm9 = vcmask 1044480   ;;  %s2334_s28 = smov 48   ;;  %vm666_vm10 = vcmask 523264   ;;  %vm668_vm11 = vcmask 654336   ;;  %p414_p1 = scmp.lt.s32.totalorder %s2407_s8, 1 }
  0x42   : > { %530 = vmatpush.bf16.msra.mxu1 %v1585_v31  ;;  %vm670_vm12 = vcmask 785408   ;;  %vm672_vm13 = vcmask 916480  }
  0x43   : > { %s2620_s8 = smov (!%p414_p1, %s2407_s8), 1 }
  0x44   : > { %517 = vmatpush.bf16.msra.mxu0 %v1573_v35  ;;  %s416_s14 = scalar_lea.vmem %s2608_s9, %s2620_s8 }
  0x46   : > { %531 = vmatpush.bf16.msra.mxu1 %v1577_v37 }
  0x48   : > { %2112 = vrot.lane.b32.xlu0 %v2111_v19, %s2329_s19 }
  0xb2   : > { %v2108_v38 = vpop.permute.xlu0 %2107 }
  0xb3   : > { %v2110_v39 = vunpack.i.h.bf16 %v2108_v38  ;;  %v2109_v40 = vunpack.i.l.bf16 %v2108_v38 }
  0xb5   : > { %v459_v44 = vsel %vm457_vm3, %v425_v5, %v2110_v39  ;;  %v458_v45 = vsel %vm457_vm3, %v429_v6, %v2109_v40 }
  0xba   : > { %v2113_v41 = vpop.permute.xlu0 %2112 }
  0xbb   : > { %v2115_v42 = vunpack.i.h.bf16 %v2113_v41  ;;  %v2114_v43 = vunpack.i.l.bf16 %v2113_v41 }
  0xbd   : > { %v461_v46 = vsel %vm460_vm4, %v458_v45, %v2114_v43  ;;  %v462_v47 = vsel %vm460_vm4, %v459_v44, %v2115_v42 }
  0xbe   : > { %v463_v48 = vpack.c.bf16 %v462_v47, %v461_v46  ;;  %v1654_v47 = vld [vmem:[#allocation8 + $0x70] sm:$0xf] }
  0xc0   : > { %1594 = vmatmul.msk.bf16.vlgmr.msra.gmra.mxu0 %vm506_vm5, %v463_v48  ;;  %1595 = vmatmul.msk.bf16.vlgmr.msra.gmra.mxu1 %vm506_vm5, %v463_v48  ;;  %v1950_v48 = vld [vmem:[#allocation8 + $0x74] sm:$0xf0] }
 0x13d   : > { %v519_v52 = vpop.f32.mrf.mxu0  ;;  %v533_v53 = vpop.f32.mrf.mxu1 }
 0x13e   : > { %v520_v54 = vadd.f32 %v519_v52, %v472_v50  ;;  %v534_v55 = vadd.f32 %v533_v53, %v473_v51  ;;  %v1718_v52 = vld [vmem:[#allocation8 + $0xf0] sm:$0xf]  ;;  %v1966_v53 = vld [vmem:[#allocation8 + $0xf4] sm:$0xf0] }
 0x140   : > { %v538_v56 = vmax.f32 %v520_v54, 0.0  ;;  %v539_v57 = vmax.f32 %v534_v55, 0.0  ;;  %v1719_v55 = vor.u32 %v1966_v53, %v1718_v52  ;;  %v1943_v53 = vld [vmem:[#allocation8 + $0x44] sm:$0xf] }
 0x142   : > { %v544_v58 = vrot.slane %v538_v56, 1  ;;  %v545_v59 = vrot.slane %v539_v57, 1  ;;  %v550_v61 = vrot.slane %v538_v56, 2  ;;  %v551_v63 = vrot.slane %v539_v57, 2  ;;  %999 = vmatpush.bf16.msra.mxu3 %v1719_v55  ;;  %v1598_v55 = vld [vmem:[#allocation8] sm:$0xf] }
 0x144   : > { %v548_v60 = vmax.f32 %v538_v56, %v544_v58  ;;  %v549_v62 = vmax.f32 %v539_v57, %v545_v59 }
 0x145   : > { %v521_v0 = vpop.f32.mrf.mxu0  ;;  %v535_v1 = vpop.f32.mrf.mxu1 }
 0x146   : > { %v554_v2 = vmax.f32 %v548_v60, %v550_v61  ;;  %v555_v3 = vmax.f32 %v549_v62, %v551_v63  ;;  %v522_v4 = vadd.f32 %v521_v0, %v472_v50  ;;  %v536_v5 = vadd.f32 %v535_v1, %v473_v51  ;;  %v1948_v51 = vld [vmem:[#allocation8 + $0x64] sm:$0xf0] }
 0x147   : > { %v1655_v50 = vor.u32 %v1950_v48, %v1654_v47  ;;  %v1956_v48 = vld [vmem:[#allocation8 + $0xa4] sm:$0xf0] }
 0x148   : > { %v540_v6 = vmax.f32 %v522_v4, 0.0  ;;  %v541_v7 = vmax.f32 %v536_v5, 0.0  ;;  %v576_v8 = vrot.slane %v554_v2, 1  ;;  %v577_v9 = vrot.slane %v555_v3, 1  ;;  %v1638_v5 = vld [vmem:[#allocation8 + $0x50] sm:$0xf] }
 0x149   : > { %v604_v10 = vsel %vm422_vm0, %v548_v60, %v554_v2  ;;  %v605_v11 = vsel %vm422_vm0, %v549_v62, %v555_v3  ;;  %v580_v20 = vrot.slane %v554_v2, 2  ;;  %v581_v22 = vrot.slane %v555_v3, 2  ;;  %986 = vmatpush.bf16.msra.mxu2 %v1655_v50  ;;  %v1978_v50 = vld [vmem:[#allocation8 + $0x154] sm:$0xf0] }
 0x14a   : > { %v558_v12 = vrot.slane %v540_v6, 1  ;;  %v559_v13 = vrot.slane %v541_v7, 1  ;;  %v564_v14 = vrot.slane %v540_v6, 2  ;;  %v565_v15 = vrot.slane %v541_v7, 2 }
 0x14b   : > { %v607_v21 = vsel %vm606_vm6, %v604_v10, %v576_v8  ;;  %v608_v23 = vsel %vm606_vm6, %v605_v11, %v577_v9  ;;  %v1964_v9 = vld [vmem:[#allocation8 + $0xe4] sm:$0xf0]  ;;  %v1630_v11 = vld [vmem:[#allocation8 + $0x40] sm:$0xf] }
 0x14c   : > { %v562_v16 = vmax.f32 %v538_v56, %v558_v12  ;;  %v570_v17 = vmax.f32 %v540_v6, %v558_v12  ;;  %v563_v18 = vmax.f32 %v539_v57, %v559_v13  ;;  %v571_v19 = vmax.f32 %v541_v7, %v559_v13  ;;  %v1946_v6 = vld [vmem:[#allocation8 + $0x54] sm:$0xf0]  ;;  %v1710_v7 = vld [vmem:[#allocation8 + $0xe0] sm:$0xf]  ;;  %v1944_v12 = vld [vmem:[#allocation8 + $0x44] sm:$0xf0] }
 0x14d   : > { %v610_v32 = vsel %vm609_vm7, %v607_v21, %v580_v20  ;;  %v611_v33 = vsel %vm609_vm7, %v608_v23, %v581_v22  ;;  %v1647_v56 = vor.u32 %v1948_v51, %v1646_v49  ;;  %v1639_v8 = vor.u32 %v1946_v6, %v1638_v5  ;;  %v1702_v13 = vld [vmem:[#allocation8 + $0xd0] sm:$0xf]  ;;  %v1942_v21 = vld [vmem:[#allocation8 + $0x34] sm:$0xf0]  ;;  %v1694_v22 = vld [vmem:[#allocation8 + $0xc0] sm:$0xf] }
 0x14e   : > { %v568_v24 = vmax.f32 %v562_v16, %v564_v14  ;;  %v572_v25 = vmax.f32 %v570_v17, %v564_v14  ;;  %v569_v26 = vmax.f32 %v563_v18, %v565_v15  ;;  %v573_v27 = vmax.f32 %v571_v19, %v565_v15  ;;  %v1962_v15 = vld [vmem:[#allocation8 + $0xd4] sm:$0xf0]  ;;  %v1949_v16 = vld [vmem:[#allocation8 + $0x74] sm:$0xf]  ;;  %v1656_v17 = vld [vmem:[#allocation8 + $0x78] sm:$0xf0] }
 0x14f   : > { %987 = vmatpush.bf16.msra.mxu2 %v1647_v56  ;;  %v1711_v10 = vor.u32 %v1964_v9, %v1710_v7  ;;  %v1631_v14 = vor.u32 %v1944_v12, %v1630_v11  ;;  %v1703_v18 = vor.u32 %v1962_v15, %v1702_v13  ;;  %v1659_v19 = vor.u32 %v1949_v16, %v1656_v17  ;;  %v1622_v20 = vld [vmem:[#allocation8 + $0x30] sm:$0xf]  ;;  %v1720_v5 = vld [vmem:[#allocation8 + $0xf8] sm:$0xf0]  ;;  %v1952_v9 = vld [vmem:[#allocation8 + $0x84] sm:$0xf0] }
 0x150   : > { %v586_v28 = vrot.slane %v568_v24, 3  ;;  %v592_v29 = vrot.slane %v572_v25, 4  ;;  %v587_v30 = vrot.slane %v569_v26, 3  ;;  %v593_v31 = vrot.slane %v573_v27, 4  ;;  %v1960_v24 = vld [vmem:[#allocation8 + $0xc4] sm:$0xf0] }
 0x151   : > { %v596_v34 = vrot.slane %v572_v25, 5  ;;  %v597_v35 = vrot.slane %v573_v27, 5  ;;  %v600_v38 = vrot.slane %v572_v25, 6  ;;  %v601_v39 = vrot.slane %v573_v27, 6  ;;  %1000 = vmatpush.bf16.msra.mxu3 %v1711_v10  ;;  %1025 = vmatpush.bf16.msrb.mxu1 %v1659_v19  ;;  %v1782_v25 = vld [vmem:[#allocation8 + $0x170] sm:$0xf] }
 0x152   : > { %v613_v36 = vsel %vm612_vm8, %v610_v32, %v586_v28  ;;  %v614_v37 = vsel %vm612_vm8, %v611_v33, %v587_v30  ;;  %v1623_v23 = vor.u32 %v1942_v21, %v1622_v20  ;;  %v1982_v26 = vld [vmem:[#allocation8 + $0x174] sm:$0xf0]  ;;  %v1695_v27 = vor.u32 %v1960_v24, %v1694_v22  ;;  %v1648_v30 = vld [vmem:[#allocation8 + $0x68] sm:$0xf0]  ;;  %v1940_v33 = vld [vmem:[#allocation8 + $0x24] sm:$0xf0] }
 0x153   : > { %v616_v40 = vsel %vm615_vm9, %v613_v36, %v592_v29  ;;  %v617_v41 = vsel %vm615_vm9, %v614_v37, %v593_v31  ;;  %988 = vmatpush.bf16.msra.mxu2 %v1639_v8  ;;  %v1783_v28 = vor.u32 %v1982_v26, %v1782_v25  ;;  %v1947_v29 = vld [vmem:[#allocation8 + $0x64] sm:$0xf]  ;;  %v1614_v31 = vld [vmem:[#allocation8 + $0x20] sm:$0xf]  ;;  %v1766_v49 = vld [vmem:[#allocation8 + $0x150] sm:$0xf] }
 0x154   : > { %v618_v42 = vsel %vm445_vm2, %v616_v40, %v596_v34  ;;  %v619_v43 = vsel %vm445_vm2, %v617_v41, %v597_v35  ;;  %v1651_v32 = vor.u32 %v1947_v29, %v1648_v30  ;;  %v1686_v34 = vld [vmem:[#allocation8 + $0xb0] sm:$0xf]  ;;  %v1958_v35 = vld [vmem:[#allocation8 + $0xb4] sm:$0xf0]  ;;  %v1615_v36 = vor.u32 %v1940_v33, %v1614_v31  ;;  %v1945_v40 = vld [vmem:[#allocation8 + $0x54] sm:$0xf] }
 0x155   : > { %v620_v44 = vsel %vm433_vm1, %v618_v42, %v600_v38  ;;  %v621_v45 = vsel %vm433_vm1, %v619_v43, %v601_v39  ;;  %1001 = vmatpush.bf16.msra.mxu3 %v1703_v18  ;;  %1012 = vmatpush.bf16.msrb.mxu0 %v1783_v28  ;;  %v1687_v37 = vor.u32 %v1958_v35, %v1686_v34  ;;  %v1774_v38 = vld [vmem:[#allocation8 + $0x160] sm:$0xf]  ;;  %v1980_v39 = vld [vmem:[#allocation8 + $0x164] sm:$0xf0]  ;;  %v1640_v42 = vld [vmem:[#allocation8 + $0x58] sm:$0xf0] }
 0x156   : > { %v2116_v46 = vpack.i.bf16 %v621_v45, %v620_v44  ;;  %1026 = vmatpush.bf16.msrb.mxu1 %v1651_v32  ;;  %v1775_v41 = vor.u32 %v1980_v39, %v1774_v38  ;;  %v1643_v43 = vor.u32 %v1945_v40, %v1640_v42  ;;  %v1767_v52 = vor.u32 %v1978_v50, %v1766_v49  ;;  %v1662_v8 = vld [vmem:[#allocation8 + $0x80] sm:$0xf]  ;;  %v1750_v11 = vld [vmem:[#allocation8 + $0x130] sm:$0xf]  ;;  %v1974_v12 = vld [vmem:[#allocation8 + $0x134] sm:$0xf0] }
 0x157   : > { %989 = vmatpush.bf16.msra.mxu2 %v1631_v14  ;;  %v1663_v10 = vor.u32 %v1952_v9, %v1662_v8  ;;  %v1939_v13 = vld [vmem:[#allocation8 + $0x24] sm:$0xf]  ;;  %v1751_v14 = vor.u32 %v1974_v12, %v1750_v11  ;;  %v1616_v15 = vld [vmem:[#allocation8 + $0x28] sm:$0xf0]  ;;  %v1981_v20 = vld [vmem:[#allocation8 + $0x174] sm:$0xf] }
 0x158   : > { %2117 = vrot.lane.b32.xlu1 %v2116_v46, %s2330_s26  ;;  %v1963_v16 = vld [vmem:[#allocation8 + $0xe4] sm:$0xf]  ;;  %v1712_v17 = vld [vmem:[#allocation8 + $0xe8] sm:$0xf0]  ;;  %v1619_v18 = vor.u32 %v1939_v13, %v1616_v15  ;;  %v1784_v21 = vld [vmem:[#allocation8 + $0x178] sm:$0xf0] }
 0x159   : > { %1002 = vmatpush.bf16.msra.mxu3 %v1695_v27  ;;  %1013 = vmatpush.bf16.msrb.mxu0 %v1775_v41  ;;  %v1715_v19 = vor.u32 %v1963_v16, %v1712_v17  ;;  %v1742_v22 = vld [vmem:[#allocation8 + $0x120] sm:$0xf]  ;;  %v1972_v24 = vld [vmem:[#allocation8 + $0x124] sm:$0xf0]  ;;  %v1937_v25 = vld [vmem:[#allocation8 + $0x14] sm:$0xf] }
 0x15a   : > { %1027 = vmatpush.bf16.msrb.mxu1 %v1643_v43  ;;  %v1608_v26 = vld [vmem:[#allocation8 + $0x18] sm:$0xf0]  ;;  %v1743_v27 = vor.u32 %v1972_v24, %v1742_v22  ;;  %v1961_v29 = vld [vmem:[#allocation8 + $0xd4] sm:$0xf]  ;;  %v1979_v31 = vld [vmem:[#allocation8 + $0x164] sm:$0xf] }
 0x15b   : > { %990 = vmatpush.bf16.msra.mxu2 %v1623_v23  ;;  %v1787_v23 = vor.u32 %v1981_v20, %v1784_v21  ;;  %v1611_v28 = vor.u32 %v1937_v25, %v1608_v26  ;;  %v1704_v30 = vld [vmem:[#allocation8 + $0xd8] sm:$0xf0]  ;;  %v1776_v33 = vld [vmem:[#allocation8 + $0x168] sm:$0xf0]  ;;  %v1734_v35 = vld [vmem:[#allocation8 + $0x110] sm:$0xf] }
 0x15c   : > { %v1707_v32 = vor.u32 %v1961_v29, %v1704_v30  ;;  %v1779_v34 = vor.u32 %v1979_v31, %v1776_v33  ;;  %v1600_v39 = vld [vmem:[#allocation8 + $0x8] sm:$0xf0]  ;;  %v1959_v40 = vld [vmem:[#allocation8 + $0xc4] sm:$0xf]  ;;  %v1957_v50 = vld [vmem:[#allocation8 + $0xb4] sm:$0xf] }
 0x15d   : > { %1003 = vmatpush.bf16.msra.mxu3 %v1687_v37  ;;  %1014 = vmatpush.bf16.msrb.mxu0 %v1767_v52  ;;  %v1935_v37 = vld [vmem:[#allocation8 + $0x4] sm:$0xf]  ;;  %v1696_v41 = vld [vmem:[#allocation8 + $0xc8] sm:$0xf0]  ;;  %v1969_v8 = vld [vmem:[#allocation8 + $0x114] sm:$0xf] }
 0x15e   : > { %v1603_v42 = vor.u32 %v1935_v37, %v1600_v39  ;;  %v1699_v43 = vor.u32 %v1959_v40, %v1696_v41  ;;  %v1736_v9 = vld [vmem:[#allocation8 + $0x118] sm:$0xf0]  ;;  %v1967_v13 = vld [vmem:[#allocation8 + $0x104] sm:$0xf] }
 0x15f   : > { %991 = vmatpush.bf16.msra.mxu2 %v1615_v36  ;;  %v1970_v36 = vld [vmem:[#allocation8 + $0x114] sm:$0xf0]  ;;  %v1739_v11 = vor.u32 %v1969_v8, %v1736_v9 }
 0x160   : > { %2122 = vrot.lane.b32.xlu1 %v2116_v46, %s2331_s27  ;;  %v1678_v46 = vld [vmem:[#allocation8 + $0xa0] sm:$0xf]  ;;  %v1735_v38 = vor.u32 %v1970_v36, %v1734_v35 }
 0x161   : > { %v1679_v51 = vor.u32 %v1956_v48, %v1678_v46  ;;  %v1968_v48 = vld [vmem:[#allocation8 + $0x104] sm:$0xf0] }
 0x163   : > { %1004 = vmatpush.bf16.msra.mxu3 %v1679_v51  ;;  %v1688_v51 = vld [vmem:[#allocation8 + $0xb8] sm:$0xf0] }
 0x164   : > { %v1691_v52 = vor.u32 %v1957_v50, %v1688_v51 }
 0x1ca   : > { %v2118_v54 = vpop.permute.xlu1 %2117 }
 0x1cb   : > { %v2120_v57 = vunpack.i.h.bf16 %v2118_v54  ;;  %v2119_v58 = vunpack.i.l.bf16 %v2118_v54  ;;  %v1632_v54 = vld [vmem:[#allocation8 + $0x48] sm:$0xf0] }
 0x1cc   : > { %v1635_v56 = vor.u32 %v1943_v53, %v1632_v54  ;;  %v1975_v53 = vld [vmem:[#allocation8 + $0x144] sm:$0xf]  ;;  %v1760_v54 = vld [vmem:[#allocation8 + $0x148] sm:$0xf0] }
 0x1cd   : > { %v635_v59 = vmax.f32 %v620_v44, %v2120_v57  ;;  %v640_v61 = vmax.f32 %v621_v45, %v2120_v57  ;;  %v626_v62 = vmax.f32 %v620_v44, %v2119_v58  ;;  %v1606_v44 = vld [vmem:[#allocation8 + $0x10] sm:$0xf]  ;;  %v1938_v45 = vld [vmem:[#allocation8 + $0x14] sm:$0xf0]  ;;  %v1936_v57 = vld [vmem:[#allocation8 + $0x4] sm:$0xf0] }
 0x1ce   : > { %v1607_v47 = vor.u32 %v1938_v45, %v1606_v44  ;;  %v1670_v58 = vld [vmem:[#allocation8 + $0x90] sm:$0xf]  ;;  %1028 = vmatpush.bf16.msrb.mxu1 %v1635_v56  ;;  %v1977_v44 = vld [vmem:[#allocation8 + $0x154] sm:$0xf]  ;;  %v1768_v45 = vld [vmem:[#allocation8 + $0x158] sm:$0xf0] }
 0x1cf   : > { %v1771_v46 = vor.u32 %v1977_v44, %v1768_v45  ;;  %v1955_v56 = vld [vmem:[#allocation8 + $0xa4] sm:$0xf] }
 0x1d0   : > { %992 = vmatpush.bf16.msra.mxu2 %v1607_v47  ;;  %v1726_v47 = vld [vmem:[#allocation8 + $0x100] sm:$0xf] }
 0x1d1   : > { %v1727_v49 = vor.u32 %v1968_v48, %v1726_v47 }
 0x1d2   : > { %v2123_v60 = vpop.permute.xlu1 %2122 }
 0x1d3   : > { %v2125_v63 = vunpack.i.h.bf16 %v2123_v60  ;;  %v2124_v0 = vunpack.i.l.bf16 %v2123_v60  ;;  %v1599_v60 = vor.u32 %v1936_v57, %v1598_v55  ;;  %v1763_v55 = vor.u32 %v1975_v53, %v1760_v54  ;;  %v1680_v57 = vld [vmem:[#allocation8 + $0xa8] sm:$0xf0] }
 0x1d5   : > { %v630_v1 = vmax.f32 %v626_v62, %v2124_v0  ;;  %v639_v2 = vmax.f32 %v635_v59, %v2125_v63  ;;  %v641_v3 = vmax.f32 %v640_v61, %v2125_v63  ;;  %v1954_v59 = vld [vmem:[#allocation8 + $0x94] sm:$0xf0]  ;;  %v1976_v63 = vld [vmem:[#allocation8 + $0x144] sm:$0xf0]  ;;  %v1941_v0 = vld [vmem:[#allocation8 + $0x34] sm:$0xf]  ;;  %993 = vmatpush.bf16.msra.mxu2 %v1599_v60 }
 0x1d6   : > { %v1671_v61 = vor.u32 %v1954_v59, %v1670_v58  ;;  %v1973_v58 = vld [vmem:[#allocation8 + $0x134] sm:$0xf]  ;;  %v1683_v59 = vor.u32 %v1955_v56, %v1680_v57  ;;  %v1752_v60 = vld [vmem:[#allocation8 + $0x138] sm:$0xf0] }
 0x1d7   : > { %654 = vrot.lane.b32.xlu1 %v641_v3, %s2332_s18  ;;  %650 = vrot.lane.b32.xlu0 %v639_v2, %s2333_s25  ;;  %v2535_v4 = vsel %vm457_vm3, %v626_v62, %v630_v1  ;;  %v1758_v62 = vld [vmem:[#allocation8 + $0x140] sm:$0xf]  ;;  %v1624_v2 = vld [vmem:[#allocation8 + $0x38] sm:$0xf0] }
 0x1d8   : > { %643 = vrot.lane.b32.xlu2 %v630_v1, %s2330_s26  ;;  %v1627_v6 = vor.u32 %v1941_v0, %v1624_v2  ;;  %1005 = vmatpush.bf16.msra.mxu3 %v1671_v61  ;;  %v1953_v61 = vld [vmem:[#allocation8 + $0x94] sm:$0xf]  ;;  %v1755_v0 = vor.u32 %v1973_v58, %v1752_v60  ;;  %v1744_v2 = vld [vmem:[#allocation8 + $0x128] sm:$0xf0] }
 0x1da   : > { %1029 = vmatpush.bf16.msrb.mxu1 %v1627_v6  ;;  %v1951_v6 = vld [vmem:[#allocation8 + $0x84] sm:$0xf] }
 0x1dc   : > { %1006 = vmatpush.bf16.msra.mxu3 %v1663_v10 }
 0x1de   : > { %1030 = vmatpush.bf16.msrb.mxu1 %v1619_v18 }
 0x1df   : > { %660 = vrot.lane.b32.xlu0 %v641_v3, %s2329_s19 }
 0x1e0   : > { %646 = vrot.lane.b32.xlu2 %v630_v1, %s2331_s27  ;;  %v1759_v1 = vor.u32 %v1976_v63, %v1758_v62  ;;  %1051 = vmatpush.bf16.msrb.mxu3 %v1787_v23  ;;  %v1672_v62 = vld [vmem:[#allocation8 + $0x98] sm:$0xf0] }
 0x1e2   : > { %1015 = vmatpush.bf16.msrb.mxu0 %v1759_v1  ;;  %1031 = vmatpush.bf16.msrb.mxu1 %v1611_v28  ;;  %v1971_v1 = vld [vmem:[#allocation8 + $0x124] sm:$0xf] }
 0x1e4   : > { %1052 = vmatpush.bf16.msrb.mxu3 %v1779_v34 }
 0x1e6   : > { %1016 = vmatpush.bf16.msrb.mxu0 %v1751_v14  ;;  %1032 = vmatpush.bf16.msrb.mxu1 %v1603_v42  ;;  %v1728_v14 = vld [vmem:[#allocation8 + $0x108] sm:$0xf0] }
 0x1e7   : > { %v1731_v15 = vor.u32 %v1967_v13, %v1728_v14 }
 0x1e8   : > { %657 = vrot.lane.b32.xlu2 %v641_v3, %s2334_s28  ;;  %v1965_v3 = vld [vmem:[#allocation8 + $0xf4] sm:$0xf]  ;;  %1053 = vmatpush.bf16.msrb.mxu3 %v1771_v46 }
 0x1e9   : > { %v1723_v7 = vor.u32 %v1965_v3, %v1720_v5  ;;  %v1675_v3 = vor.u32 %v1953_v61, %v1672_v62  ;;  %v1747_v5 = vor.u32 %v1971_v1, %v1744_v2 }
 0x1ea   : > { %1017 = vmatpush.bf16.msrb.mxu0 %v1743_v27 }
 0x1eb   : > { %1038 = vmatpush.bf16.msrb.mxu2 %v1723_v7  ;;  %v1664_v7 = vld [vmem:[#allocation8 + $0x88] sm:$0xf0] }
 0x1ec   : > { %1054 = vmatpush.bf16.msrb.mxu3 %v1763_v55  ;;  %v1667_v10 = vor.u32 %v1951_v6, %v1664_v7 }
 0x1ee   : > { %1018 = vmatpush.bf16.msrb.mxu0 %v1735_v38  ;;  %v740_v38 = vld [vmem:[%s2603_s4] sm:$0x3] }
 0x1ef   : > { %1039 = vmatpush.bf16.msrb.mxu2 %v1715_v19  ;;  %v742_v40 = vperm.slane %v740_v38, 0 }
 0x1f0   : > { %1055 = vmatpush.bf16.msrb.mxu3 %v1755_v0 }
 0x1f2   : > { %1019 = vmatpush.bf16.msrb.mxu0 %v1727_v49 }
 0x1f3   : > { %1040 = vmatpush.bf16.msrb.mxu2 %v1707_v32 }
 0x1f4   : > { %1056 = vmatpush.bf16.msrb.mxu3 %v1747_v5 }
 0x1f7   : > { %1041 = vmatpush.bf16.msrb.mxu2 %v1699_v43 }
 0x1f8   : > { %1057 = vmatpush.bf16.msrb.mxu3 %v1739_v11 }
 0x1fb   : > { %1042 = vmatpush.bf16.msrb.mxu2 %v1691_v52  ;;  %v743_v52 = vperm.slane %v740_v38, 1  ;;  %v2002_v38 = vld [vmem:[#allocation10 + $0x98] sm:$0xff] }
 0x1fc   : > { %1058 = vmatpush.bf16.msrb.mxu3 %v1731_v15  ;;  %v1990_v15 = vld [vmem:[#allocation10 + $0x38] sm:$0xff] }
 0x1fd   : > { %1395 = vmatpush.bf16.msra.mxu0 %v1990_v15 }
 0x1ff   : > { %1043 = vmatpush.bf16.msrb.mxu2 %v1683_v59 }
 0x203   : > { %1044 = vmatpush.bf16.msrb.mxu2 %v1675_v3 }
 0x207   : > { %1045 = vmatpush.bf16.msrb.mxu2 %v1667_v10 }
 0x232   : > { %v644_v63 = vpop.permute.xlu2 %643 }
 0x233   : > { %v664_v16 = vsel %vm460_vm4, %v2535_v4, %v644_v63 }
 0x23a   : > { %v647_v12 = vpop.permute.xlu2 %646 }
 0x23b   : > { %v665_v18 = vsel %vm506_vm5, %v664_v16, %v647_v12  ;;  %v1998_v16 = vld [vmem:[#allocation10 + $0x78] sm:$0xff] }
 0x23c   : > { %1408 = vmatpush.bf16.msra.mxu1 %v1998_v16  ;;  %v1448_v16 = vld [vmem:[%s2606_s7] sm:$0x1] }
 0x242   : > { %v658_v22 = vpop.permute.xlu2 %657 }
 0x249   : > { %v651_v17 = vpop.permute.xlu0 %650  ;;  %v655_v19 = vpop.permute.xlu1 %654 }
 0x24a   : > { %v667_v20 = vsel %vm666_vm10, %v665_v18, %v651_v17  ;;  %v2006_v17 = vld [vmem:[#allocation10 + $0xb8] sm:$0xff] }
 0x24b   : > { %v669_v21 = vsel %vm668_vm11, %v667_v20, %v655_v19  ;;  %v2014_v18 = vld [vmem:[#allocation10 + $0xf8] sm:$0xff] }
 0x24c   : > { %v671_v24 = vsel %vm670_vm12, %v669_v21, %v658_v22 }
 0x251   : > { %v661_v23 = vpop.permute.xlu0 %660 }
 0x252   : > { %v673_v25 = vsel %vm672_vm13, %v671_v24, %v661_v23 }
 0x253   : > { %v675_v26 = vrot.slane %v673_v25, 7  ;;  %v1989_v25 = vld [vmem:[#allocation10 + $0x30] sm:$0xff] }
 0x254   : > { %1396 = vmatpush.bf16.msra.mxu0 %v1989_v25 }
 0x255   : > { %v677_v4 = vsel %vm422_vm0, 0.0, %v675_v26  ;;  %v678_v27 = vsel %vm422_vm0, %v675_v26, 0.0  ;;  %v1791_v28 = vpack.c.bf16 %v675_v26, %v675_v26  ;;  %v1997_v26 = vld [vmem:[#allocation10 + $0x70] sm:$0xff] }
 0x256   : > { %v685_v29 = vrot.slane %v677_v4, 2  ;;  %v686_v30 = vrot.slane %v678_v27, 2  ;;  %v681_v31 = vrot.slane %v677_v4, 1  ;;  %v682_v32 = vrot.slane %v678_v27, 1  ;;  %v2005_v4 = vld [vmem:[#allocation10 + $0xb0] sm:$0xff]  ;;  %1409 = vmatpush.bf16.msra.mxu1 %v1997_v26 }
 0x257   : > { %1792 = vmatmul.msk.bf16.vlgmr.msra.gmra.mxu2 %vm1790_vm15, %v1791_v28  ;;  %1797 = vmatmul.msk.bf16.vlgmr.msrb.gmra.mxu1 %vm1790_vm15, %v1791_v28  ;;  %v2013_v27 = vld [vmem:[#allocation10 + $0xf0] sm:$0xff]  ;;  %v1988_v28 = vld [vmem:[#allocation10 + $0x28] sm:$0xff] }
 0x258   : > { %v683_v33 = vsel %vm433_vm1, %v681_v31, %v682_v32  ;;  %v687_v34 = vsel %vm445_vm2, %v685_v29, %v686_v30  ;;  %1421 = vmatpush.bf16.msra.mxu2 %v2006_v17  ;;  %v1996_v29 = vld [vmem:[#allocation10 + $0x68] sm:$0xff]  ;;  %1397 = vmatpush.bf16.msra.mxu0 %v1988_v28  ;;  %v1987_v32 = vld [vmem:[#allocation10 + $0x20] sm:$0xff]  ;;  %vm1455_vm1 = vcmask 0  }
 0x259   : > { %v690_v35 = vpack.c.bf16 %v683_v33, %v683_v33  ;;  %v691_v36 = vpack.c.bf16 %v687_v34, %v687_v34  ;;  %v2004_v30 = vld [vmem:[#allocation10 + $0xa8] sm:$0xff]  ;;  %v1995_v33 = vld [vmem:[#allocation10 + $0x60] sm:$0xff] }
 0x25a   : > { %v2012_v31 = vld [vmem:[#allocation10 + $0xe8] sm:$0xff]  ;;  %1410 = vmatpush.bf16.msra.mxu1 %v1996_v29  ;;  %v2003_v34 = vld [vmem:[#allocation10 + $0xa0] sm:$0xff] }
 0x25b   : > { %1007 = vmatmul.bf16.vlgmr.msra.gmra.mxu3 %v690_v35  ;;  %1020 = vmatmul.bf16.vlgmr.msrb.gmra.mxu0 %v691_v36 }
 0x25c   : > { %1434 = vmatpush.bf16.msra.mxu3 %v2014_v18  ;;  %1422 = vmatpush.bf16.msra.mxu2 %v2005_v4 }
 0x25d   : > { %1398 = vmatpush.bf16.msra.mxu0 %v1987_v32 }
 0x25e   : > { %1411 = vmatpush.bf16.msra.mxu1 %v1995_v33 }
 0x260   : > { %1435 = vmatpush.bf16.msra.mxu3 %v2013_v27  ;;  %1423 = vmatpush.bf16.msra.mxu2 %v2004_v30 }
 0x264   : > { %1436 = vmatpush.bf16.msra.mxu3 %v2012_v31  ;;  %1424 = vmatpush.bf16.msra.mxu2 %v2003_v34 }
 0x267   : > { %1046 = vmatmul.bf16.vlgmr.msrb.gmra.mxu2 %v690_v35  ;;  %v2011_v35 = vld [vmem:[#allocation10 + $0xe0] sm:$0xff] }
 0x268   : > { %1437 = vmatpush.bf16.msra.mxu3 %v2011_v35  ;;  %1425 = vmatpush.bf16.msra.mxu2 %v2002_v38 }
 0x26b   : > { %1059 = vmatmul.bf16.vlgmr.msrb.gmra.mxu3 %v691_v36  ;;  %v1986_v36 = vld [vmem:[#allocation10 + $0x18] sm:$0xff] }
 0x26c   : > { %1399 = vmatpush.bf16.msra.mxu0 %v1986_v36 }
 0x2d4   : > { %v1034_v37 = vpop.f32.mrf.mxu1 }
 0x2d5   : > { %v1035_v57 = vadd.f32 %v1034_v37, %v743_v52  ;;  %v1994_v37 = vld [vmem:[#allocation10 + $0x58] sm:$0xff] }
 0x2d6   : > { %1412 = vmatpush.bf16.msra.mxu1 %v1994_v37 }
 0x2d8   : > { %v1021_v39 = vpop.f32.mrf.mxu0 }
 0x2da   : > { %v995_v41 = vpop.f32.mrf.mxu2 }
 0x2db   : > { %v996_v43 = vadd.f32 %v995_v41, %v742_v40  ;;  %v1985_v40 = vld [vmem:[#allocation10 + $0x10] sm:$0xff] }
 0x2dc   : > { %v1036_v42 = vpop.f32.mrf.mxu1  ;;  %v1993_v41 = vld [vmem:[#allocation10 + $0x50] sm:$0xff]  ;;  %1400 = vmatpush.bf16.msra.mxu0 %v1985_v40 }
 0x2dd   : > { %v2001_v42 = vld [vmem:[#allocation10 + $0x90] sm:$0xff]  ;;  %1413 = vmatpush.bf16.msra.mxu1 %v1993_v41 }
 0x2de   : > { %v1008_v44 = vpop.f32.mrf.mxu3  ;;  %1426 = vmatpush.bf16.msra.mxu2 %v2001_v42 }
 0x2df   : > { %v1009_v45 = vadd.f32 %v1008_v44, %v996_v43  ;;  %v2009_v43 = vld [vmem:[#allocation10 + $0xd0] sm:$0xff]  ;;  %v1984_v44 = vld [vmem:[#allocation10 + $0x8] sm:$0xff] }
 0x2e0   : > { %v1023_v46 = vpop.f32.mrf.mxu0  ;;  %1401 = vmatpush.bf16.msra.mxu0 %v1984_v44 }
 0x2e1   : > { %v1022_v47 = vadd.f32 %v1021_v39, %v1009_v45  ;;  %v2010_v39 = vld [vmem:[#allocation10 + $0xd8] sm:$0xff]  ;;  %v1992_v45 = vld [vmem:[#allocation10 + $0x48] sm:$0xff] }
 0x2e2   : > { %v997_v48 = vpop.f32.mrf.mxu2  ;;  %1438 = vmatpush.bf16.msra.mxu3 %v2010_v39  ;;  %v2000_v46 = vld [vmem:[#allocation10 + $0x88] sm:$0xff]  ;;  %1414 = vmatpush.bf16.msra.mxu1 %v1992_v45 }
 0x2e3   : > { %v1064_v49 = vmax.f32 %v1022_v47, 0.0  ;;  %v2008_v47 = vld [vmem:[#allocation10 + $0xc8] sm:$0xff]  ;;  %1427 = vmatpush.bf16.msra.mxu2 %v2000_v46  ;;  %v1983_v48 = vld [vmem:[#allocation10] sm:$0xff] }
 0x2e4   : > { %1402 = vmatpush.bf16.msra.mxu0 %v1983_v48 }
 0x2e5   : > { %v1068_v50 = vrot.slane %v1064_v49, 1  ;;  %v1074_v54 = vrot.slane %v1064_v49, 2 }
 0x2e6   : > { %v1010_v51 = vpop.f32.mrf.mxu3  ;;  %1439 = vmatpush.bf16.msra.mxu3 %v2009_v43 }
 0x2e7   : > { %v1072_v53 = vmax.f32 %v1064_v49, %v1068_v50  ;;  %v1991_v49 = vld [vmem:[#allocation10 + $0x40] sm:$0xff] }
 0x2e8   : > { %v1999_v50 = vld [vmem:[#allocation10 + $0x80] sm:$0xff]  ;;  %1415 = vmatpush.bf16.msra.mxu1 %v1991_v49 }
 0x2e9   : > { %v1078_v55 = vmax.f32 %v1072_v53, %v1074_v54  ;;  %v2007_v51 = vld [vmem:[#allocation10 + $0xc0] sm:$0xff]  ;;  %1428 = vmatpush.bf16.msra.mxu2 %v1999_v50 }
 0x2ea   : > { %v1047_v56 = vpop.f32.mrf.mxu2  ;;  %1440 = vmatpush.bf16.msra.mxu3 %v2008_v47 }
 0x2eb   : > { %v1082_v58 = vrot.slane %v1078_v55, 1  ;;  %v1086_v59 = vrot.slane %v1078_v55, 2  ;;  %v1090_v60 = vsel %vm422_vm0, %v1072_v53, %v1078_v55  ;;  %v1048_v61 = vadd.f32 %v1047_v56, %v1035_v57 }
 0x2ed   : > { %v1092_v62 = vsel %vm606_vm6, %v1090_v60, %v1082_v58 }
 0x2ee   : > { %v1060_v63 = vpop.f32.mrf.mxu3  ;;  %v2556_v0 = vsel %vm609_vm7, %v1092_v62, %v1086_v59  ;;  %1441 = vmatpush.bf16.msra.mxu3 %v2007_v51 }
 0x2ef   : > { %v1061_v1 = vadd.f32 %v1060_v63, %v1048_v61  ;;  %1097 = vrot.lane.b32.xlu0 %v2556_v0, %s2331_s27 }
 0x2f1   : > { %v1065_v2 = vmax.f32 %v1061_v1, 0.0 }
 0x2f2   : > { %v1049_v3 = vpop.f32.mrf.mxu2 }
 0x2f3   : > { %v1069_v5 = vrot.slane %v1065_v2, 1  ;;  %v1075_v7 = vrot.slane %v1065_v2, 2 }
 0x2f5   : > { %v1073_v6 = vmax.f32 %v1065_v2, %v1069_v5 }
 0x2f6   : > { %v1062_v8 = vpop.f32.mrf.mxu3 }
 0x2f7   : > { %v1079_v9 = vmax.f32 %v1073_v6, %v1075_v7 }
 0x2f9   : > { %v1083_v10 = vrot.slane %v1079_v9, 1  ;;  %v1087_v11 = vrot.slane %v1079_v9, 2  ;;  %v1091_v12 = vsel %vm422_vm0, %v1073_v6, %v1079_v9 }
 0x2fb   : > { %v1093_v13 = vsel %vm606_vm6, %v1091_v12, %v1083_v10 }
 0x2fc   : > { %v1095_v14 = vsel %vm609_vm7, %v1093_v13, %v1087_v11 }
 0x2fd   : > { %1110 = vrot.lane.b32.xlu2 %v1095_v14, %s2332_s18  ;;  %1106 = vrot.lane.b32.xlu1 %v1095_v14, %s2331_s27 }
 0x305   : > { %1101 = vrot.lane.b32.xlu1 %v2556_v0, %s2332_s18 }
 0x357   : > { %v1111_v22 = vpop.permute.xlu2 %1110 }
 0x361   : > { %v1098_v52 = vpop.permute.xlu0 %1097 }
 0x362   : > { %v1100_v54 = vmax.f32 %v2556_v0, %v1098_v52 }
 0x36f   : > { %v1107_v19 = vpop.permute.xlu1 %1106 }
 0x370   : > { %v1109_v20 = vmax.f32 %v2556_v0, %v1107_v19  ;;  %v1114_v21 = vmax.f32 %v1095_v14, %v1107_v19  ;;  %v1202_v0 = vld [vmem:[%s2605_s6] sm:$0x1] }
 0x372   : > { %v1113_v23 = vmax.f32 %v1109_v20, %v1111_v22  ;;  %v1115_v24 = vmax.f32 %v1114_v21, %v1111_v22  ;;  %v1453_v22 = vld [vmem:[#allocation2] sm:$0x1] }
 0x374   : > { %1121 = vrot.lane.b32.xlu0 %v1115_v24, %s2332_s18  ;;  %1117 = vrot.lane.b32.xlu2 %v1113_v23, %s2331_s27 }
 0x377   : > { %v1102_v53 = vpop.permute.xlu1 %1101 }
 0x378   : > { %v1104_v55 = vmax.f32 %v1100_v54, %v1102_v53 }
 0x37a   : > { %v1124_v57 = vsel %vm460_vm4, %v1100_v54, %v1104_v55 }
 0x3ce   : > { %v1118_v56 = vpop.permute.xlu2 %1117 }
 0x3cf   : > { %v1125_v58 = vsel %vm666_vm10, %v1124_v57, %v1118_v56 }
 0x3e6   : > { %v1122_v59 = vpop.permute.xlu0 %1121 }
 0x3e7   : > { %v1126_v60 = vsel %vm670_vm12, %v1125_v58, %v1122_v59 }
 0x3e8   : > { %v1128_v61 = vrot.slane %v1126_v60, 1  ;;  %v1130_v62 = vrot.slane %v1126_v60, 2  ;;  %v1132_v63 = vrot.slane %v1126_v60, 3  ;;  %v1134_v1 = vpack.c.bf16 %v1126_v60, %v1126_v60 }
 0x3ea   : > { %v1135_v2 = vpack.c.bf16 %v1128_v61, %v1128_v61  ;;  %v1136_v3 = vpack.c.bf16 %v1130_v62, %v1130_v62  ;;  %v1137_v5 = vpack.c.bf16 %v1132_v63, %v1132_v63  ;;  %1403 = vmatmul.bf16.vlgmr.msra.gmra.mxu0 %v1134_v1 }
 0x3ec   : > { %1416 = vmatmul.bf16.vlgmr.msra.gmra.mxu1 %v1135_v2  ;;  %1429 = vmatmul.bf16.vlgmr.msra.gmra.mxu2 %v1136_v3 }
 0x3ed   : > { %1442 = vmatmul.bf16.vlgmr.msra.gmra.mxu3 %v1137_v5 }
 0x467   : > { %v1404_v6 = vpop.f32.mrf.mxu0 }
 0x468   : > { %v1405_v8 = vadd.f32 %v1404_v6, %v1202_v0 }
 0x469   : > { %v1417_v7 = vpop.f32.mrf.mxu1 }
 0x46a   : > { %v1418_v9 = vadd.f32 %v1417_v7, %v1405_v8 }
 0x46f   : > { %v1406_v10 = vpop.f32.mrf.mxu0  ;;  %v1430_v11 = vpop.f32.mrf.mxu2 }
 0x470   : > { %v1431_v12 = vadd.f32 %v1430_v11, %v1418_v9  ;;  %v1443_v13 = vpop.f32.mrf.mxu3 }
 0x471   : > { %v1419_v14 = vpop.f32.mrf.mxu1 }
 0x472   : > { %v1444_v15 = vadd.f32 %v1443_v13, %v1431_v12 }
 0x474   : > { %v1447_v17 = vmax.f32 %v1444_v15, 0.0 }
 0x476   : > { %v1449_v18 = vmul.f32 %v1448_v16, %v1447_v17 }
 0x477   : > { %v1432_v19 = vpop.f32.mrf.mxu2 }
 0x478   : > { %v1445_v20 = vpop.f32.mrf.mxu3  ;;  %v1450_v21 = vsel %vm422_vm0, %v1449_v18, 0.0 }
 0x479   : > { %1451 = vadd.xlane.f32.xlu1 %v1450_v21 }
 0x4ec   : > { %v1452_v23 = vpop.xlane.xlu1 %1451 }
 0x4ed   : > { %v1454_v24 = vadd.f32 %v1453_v22, %v1452_v23 }
 0x4ef   : > { %1456 = vst.msk [vmem:[%s416_s14] sm:$0x1] %vm1455_vm1, %v1454_v24 }
 0x4f0 PF: > { %p23_p4 = scmp.ge.s32.totalorder %s2458_s29, 4   ;;  %s2615_s11 = smov %s2310_s12 }
 0x4f1   : > { %s2616_s12 = smov %s2314_s13  ;;  %s2617_s13 = smov %s2467_s16 }
 0x4f2   : > { %s2618_s14 = smov %s2458_s29  ;;  %25 = sbr.rel (!%p23_p4) target bundleno = 8 (0x8), region = 112 }
 0x4f7   :  { %1474 = vsyncpa [#allocation4], 1 }
 0x4f8   :  { %1476 = vsyncpa [#allocation4 + $0x1], 1 }
 0x4f9   :  { %1477 = vsyncpa [#allocation6], 1 }
 0x4fa   :  { %1478 = vsyncpa [#allocation9], 1 }

</bundles_post_ra>
